<compile_context>
chip_gen: v6e
topology: v6e:2x2x1
jax: 0.10.0
libtpu: 0.0.40
codegen_flags: <defaults>
</compile_context>

<pallas_src>
import functools
import math

import jax
import jax.numpy as jnp
import numpy as np
from jax.experimental import pallas as pl
from jax.experimental.pallas import tpu as pltpu


# ---------------------------------------------------------------------------
# Kernel
# ---------------------------------------------------------------------------
def _sage_layer_kernel(adj_ref, xk_ref, xi_ref, invdeg_ref,
                       wl_ref, wr_ref, b_ref, scale_ref, shift_ref,
                       out_ref, acc_ref,
                       *, c_out, apply_bn_relu, apply_log_softmax):
    """One grid step of a fused SAGEConv layer.

    grid = (row tiles i, reduction tiles k) over the dense adjacency.

      adj_ref:    [TM, TK]      bf16  0/1 adjacency tile (row tile i, col tile k)
      xk_ref:     [TK, Cin_p]   bf16  features of the k-th block of source nodes
      xi_ref:     [TM, Cin_p]   bf16  features of the row tile itself (self term)
      invdeg_ref: [TM, 1]       f32   1/deg for the row tile
      wl_ref:     [Cin_p,Cout_p] bf16 lin_l weight (neighbor path), padded
      wr_ref:     [Cin_p,Cout_p] bf16 lin_r weight (self path), padded
      b_ref:      [1, Cout_p]   f32   lin_l bias, padded with zeros
      scale_ref:  [1, Cout_p]   f32   fused BN scale  = gamma * rsqrt(var + eps)
      shift_ref:  [1, Cout_p]   f32   fused BN shift  = beta - mean * scale
      out_ref:    [TM, Cout_p]  out dtype
      acc_ref:    [TM, Cin_p]   f32   VMEM scratch accumulator (neighbor sum)
    """
    k = pl.program_id(1)
    nk = pl.num_programs(1)

    @pl.when(k == 0)
    def _init():
        acc_ref[...] = jnp.zeros_like(acc_ref)

    # Neighbor-sum: bf16 x bf16 MXU matmul, f32 accumulation.
    acc_ref[...] += jnp.dot(adj_ref[...], xk_ref[...],
                            preferred_element_type=jnp.float32)

    @pl.when(k == nk - 1)
    def _finalize():
        # Mean aggregation: scale neighbor sum by 1/deg (f32, hidden under MXU).
        agg = (acc_ref[...] * invdeg_ref[...]).astype(jnp.bfloat16)

        # SAGEConv: lin_l(mean_j x_j) + lin_r(x_i)  (+ bias, which lives in lin_l).
        h = jnp.dot(agg, wl_ref[...], preferred_element_type=jnp.float32)
        h = h + jnp.dot(xi_ref[...], wr_ref[...],
                        preferred_element_type=jnp.float32)
        h = h + b_ref[...]

        if apply_bn_relu:
            # Eval-mode BatchNorm1d fused to one FMA, then ReLU.
            h = jnp.maximum(h * scale_ref[...] + shift_ref[...], 0.0)

        if apply_log_softmax:
            # Mask the padded lanes (>= c_out) so they don't pollute max / sum(exp).
            col = jax.lax.broadcasted_iota(jnp.int32, h.shape, 1)
            hm = jnp.where(col < c_out, h, jnp.float32(-1e30))
            m = jnp.max(hm, axis=-1, keepdims=True)
            s = hm - m
            lse = jnp.log(jnp.sum(jnp.exp(s), axis=-1, keepdims=True))
            h = s - lse

        out_ref[...] = h.astype(out_ref.dtype)


# ---------------------------------------------------------------------------
# Per-layer wrapper
# ---------------------------------------------------------------------------
def sage_layer(adj_p, x_p, invdeg_p, wl_p, wr_p, b_p, scale_p, shift_p,
               *, c_out, apply_bn_relu, apply_log_softmax, out_dtype,
               tm=128, tk=128):
    n_p = adj_p.shape[0]
    cin_p = x_p.shape[1]
    cout_p = wl_p.shape[1]
    ni, nk = n_p // tm, n_p // tk

    kernel = functools.partial(_sage_layer_kernel,
                               c_out=c_out,
                               apply_bn_relu=apply_bn_relu,
                               apply_log_softmax=apply_log_softmax)

    out_itemsize = np.dtype(out_dtype).itemsize
    flops = 2 * n_p * n_p * cin_p + 4 * n_p * cin_p * cout_p
    transcendentals = n_p * cout_p if apply_log_softmax else 0
    bytes_accessed = (2 * n_p * n_p                 # bf16 adjacency stream
                      + 2 * 2 * n_p * cin_p         # x read twice (agg + self)
                      + 2 * 2 * cin_p * cout_p      # Wl, Wr
                      + 4 * n_p                     # 1/deg
                      + 3 * 4 * cout_p              # bias / BN scale / BN shift
                      + out_itemsize * n_p * cout_p)

    grid_spec = pltpu.PrefetchScalarGridSpec(
        num_scalar_prefetch=0,
        grid=(ni, nk),
        in_specs=[
            pl.BlockSpec((tm, tk), lambda i, k: (i, k)),        # adj tile
            pl.BlockSpec((tk, cin_p), lambda i, k: (k, 0)),     # x (aggregation K-tile)
            pl.BlockSpec((tm, cin_p), lambda i, k: (i, 0)),     # x (row tile, self term)
            pl.BlockSpec((tm, 1), lambda i, k: (i, 0)),         # 1/deg
            pl.BlockSpec((cin_p, cout_p), lambda i, k: (0, 0)),  # Wl (resident)
            pl.BlockSpec((cin_p, cout_p), lambda i, k: (0, 0)),  # Wr (resident)
            pl.BlockSpec((1, cout_p), lambda i, k: (0, 0)),     # bias
            pl.BlockSpec((1, cout_p), lambda i, k: (0, 0)),     # BN scale
            pl.BlockSpec((1, cout_p), lambda i, k: (0, 0)),     # BN shift
        ],
        out_specs=pl.BlockSpec((tm, cout_p), lambda i, k: (i, 0)),
        scratch_shapes=[pltpu.VMEM((tm, cin_p), jnp.float32)],
    )

    return pl.pallas_call(
        kernel,
        out_shape=jax.ShapeDtypeStruct((n_p, cout_p), out_dtype),
        grid_spec=grid_spec,
        compiler_params=pltpu.CompilerParams(
            dimension_semantics=("parallel", "arbitrary")),
        cost_estimate=pl.CostEstimate(flops=flops,
                                      transcendentals=transcendentals,
                                      bytes_accessed=bytes_accessed),
    )(adj_p, x_p, x_p, invdeg_p, wl_p, wr_p, b_p, scale_p, shift_p)


# ---------------------------------------------------------------------------
# Full forward pass
# ---------------------------------------------------------------------------
def _round_up(v, m):
    return ((v + m - 1) // m) * m


def _pad_2d(a, rows, cols, value=0.0):
    return jnp.pad(a, ((0, rows - a.shape[0]), (0, cols - a.shape[1])),
                   constant_values=value)


def _pad_row_vec(v, n):
    return jnp.pad(v, (0, n - v.shape[0])).reshape(1, -1).astype(jnp.float32)


def sage_forward(params, x, adj, *, tm=128, tk=128):
    """SAGE forward (eval mode): hidden layers = SAGEConv->BN->ReLU, last = SAGEConv->log_softmax."""
    n, c_in = x.shape
    num_layers = len(params["wl"])

    mult = tm * tk // math.gcd(tm, tk)
    n_p = _round_up(n, mult)

    # 0/1 adjacency streamed as bf16 (exact); mean normalization via 1/deg in f32.
    deg = jnp.maximum(jnp.sum(adj, axis=1, keepdims=True), 1.0)
    invdeg_p = _pad_2d(1.0 / deg, n_p, 1, value=1.0).astype(jnp.float32)
    adj_p = _pad_2d(adj, n_p, n_p).astype(jnp.bfloat16)

    h = _pad_2d(x, n_p, _round_up(c_in, 128)).astype(jnp.bfloat16)

    for i in range(num_layers):
        is_last = i == num_layers - 1
        cin, cout = params["wl"][i].shape
        cin_p, cout_p = _round_up(cin, 128), _round_up(cout, 128)

        wl_p = _pad_2d(params["wl"][i], cin_p, cout_p).astype(jnp.bfloat16)
        wr_p = _pad_2d(params["wr"][i], cin_p, cout_p).astype(jnp.bfloat16)
        b_p = _pad_row_vec(params["b"][i], cout_p)

        if not is_last:
            scale = params["gamma"][i] * jax.lax.rsqrt(params["rvar"][i] + 1e-5)
            shift = params["beta"][i] - params["rmean"][i] * scale
        else:
            scale = jnp.zeros((cout,), jnp.float32)
            shift = jnp.zeros((cout,), jnp.float32)
        scale_p = _pad_row_vec(scale, cout_p)
        shift_p = _pad_row_vec(shift, cout_p)

        h = sage_layer(adj_p, h, invdeg_p, wl_p, wr_p, b_p, scale_p, shift_p,
                       c_out=cout,
                       apply_bn_relu=not is_last,
                       apply_log_softmax=is_last,
                       out_dtype=jnp.float32 if is_last else jnp.bfloat16,
                       tm=tm, tk=tk)

    return h[:n, :params["wl"][-1].shape[1]]


# ---------------------------------------------------------------------------
# References (plain JAX) for correctness checks
# ---------------------------------------------------------------------------
def _reference_forward_mixed(params, x, adj):
    """Plain-JAX reference using the same bf16/f32 mixed precision as the kernel."""
    adj_b = adj.astype(jnp.bfloat16)
    inv_deg = 1.0 / jnp.maximum(jnp.sum(adj, axis=1, keepdims=True), 1.0)
    num_layers = len(params["wl"])
    h = x.astype(jnp.bfloat16)
    for i in range(num_layers):
        wl = params["wl"][i].astype(jnp.bfloat16)
        wr = params["wr"][i].astype(jnp.bfloat16)
        acc = jnp.dot(adj_b, h, preferred_element_type=jnp.float32)
        agg = (acc * inv_deg).astype(jnp.bfloat16)
        z = (jnp.dot(agg, wl, preferred_element_type=jnp.float32)
             + jnp.dot(h, wr, preferred_element_type=jnp.float32)
             + params["b"][i])
        if i < num_layers - 1:
            scale = params["gamma"][i] * jax.lax.rsqrt(params["rvar"][i] + 1e-5)
            shift = params["beta"][i] - params["rmean"][i] * scale
            h = jnp.maximum(z * scale + shift, 0.0).astype(jnp.bfloat16)
        else:
            h = jax.nn.log_softmax(z, axis=-1)
    return h


def _reference_forward_f32(params, x, adj):
    """Full-f32 reference matching the PyTorch module semantics (eval mode)."""
    inv_deg = 1.0 / jnp.maximum(jnp.sum(adj, axis=1, keepdims=True), 1.0)
    num_layers = len(params["wl"])
    h = x
    for i in range(num_layers):
        agg = (adj @ h) * inv_deg
        z = agg @ params["wl"][i] + h @ params["wr"][i] + params["b"][i]
        if i < num_layers - 1:
            z = ((z - params["rmean"][i]) * jax.lax.rsqrt(params["rvar"][i] + 1e-5)
                 * params["gamma"][i] + params["beta"][i])
            h = jnp.maximum(z, 0.0)
        else:
            h = jax.nn.log_softmax(z, axis=-1)
    return h


# ---------------------------------------------------------------------------
# Parameter init
# ---------------------------------------------------------------------------
def init_params(key, in_channels, hidden_channels, out_channels, num_layers):
    dims = [in_channels] + [hidden_channels] * (num_layers - 1) + [out_channels]
    params = {"wl": [], "wr": [], "b": [], "gamma": [], "beta": [],
              "rmean": [], "rvar": []}
    for i in range(num_layers):
        cin, cout = dims[i], dims[i + 1]
        key, k1, k2, k3, k4, k5, k6, k7 = jax.random.split(key, 8)
        scale = 1.0 / np.sqrt(cin)
        # Weights stored already transposed: [Cin, Cout]
        params["wl"].append(jax.random.uniform(k1, (cin, cout), jnp.float32,
                                               -scale, scale))
        params["wr"].append(jax.random.uniform(k2, (cin, cout), jnp.float32,
                                               -scale, scale))
        params["b"].append(jax.random.uniform(k3, (cout,), jnp.float32,
                                              -scale, scale))
        # BatchNorm params (only used for hidden layers)
        params["gamma"].append(jax.random.uniform(k4, (cout,), jnp.float32, 0.8, 1.2))
        params["beta"].append(jax.random.uniform(k5, (cout,), jnp.float32, -0.1, 0.1))
        params["rmean"].append(jax.random.uniform(k6, (cout,), jnp.float32, -0.1, 0.1))
        params["rvar"].append(jax.random.uniform(k7, (cout,), jnp.float32, 0.5, 1.5))
    return params


if __name__ == "__main__":
    # Small synthetic graph: 256 nodes, 16 input features, 32 hidden, 8 classes, 3 layers.
    # (256 nodes -> a real 2x2 grid of (128,128) adjacency tiles is exercised.)
    N, C_IN, C_HID, C_OUT, NUM_LAYERS = 256, 16, 32, 8, 3

    key = jax.random.PRNGKey(0)
    key, kx, ka = jax.random.split(key, 3)

    x = jax.random.normal(kx, (N, C_IN), jnp.float32)
    adj = (jax.random.uniform(ka, (N, N)) < 0.05).astype(jnp.float32)  # 0/1 adjacency

    params = init_params(key, C_IN, C_HID, C_OUT, NUM_LAYERS)

    fwd = jax.jit(functools.partial(sage_forward, tm=128, tk=128))
    out = jax.block_until_ready(fwd(params, x, adj))

    # Tight check against a plain-JAX reference with identical mixed precision.
    ref_mixed = _reference_forward_mixed(params, x, adj)
    np.testing.assert_allclose(np.asarray(out), np.asarray(ref_mixed),
                               rtol=1e-3, atol=1e-3)

    # Loose sanity check against the full-f32 (PyTorch-faithful) reference:
    # only bf16 rounding of activations/weights separates the two.
    ref_f32 = _reference_forward_f32(params, x, adj)
    max_err = float(jnp.max(jnp.abs(jnp.asarray(out) - ref_f32)))
    assert max_err < 0.25, f"mixed-precision drift vs f32 reference too large: {max_err}"

    print("KERNEL_OK")
</pallas_src>

<mosaic_0001>
module attributes {stable_mosaic.version = 11 : i64} {
  func.func @_sage_layer_kernel(%arg0: i32, %arg1: i32, %arg2: memref<128x128xbf16, #tpu.memory_space<vmem>>, %arg3: memref<128x128xbf16, #tpu.memory_space<vmem>>, %arg4: memref<128x128xbf16, #tpu.memory_space<vmem>>, %arg5: memref<128x1xf32, #tpu.memory_space<vmem>>, %arg6: memref<128x128xbf16, #tpu.memory_space<vmem>>, %arg7: memref<128x128xbf16, #tpu.memory_space<vmem>>, %arg8: memref<1x128xf32, #tpu.memory_space<vmem>>, %arg9: memref<1x128xf32, #tpu.memory_space<vmem>>, %arg10: memref<1x128xf32, #tpu.memory_space<vmem>>, %arg11: memref<128x128xbf16, #tpu.memory_space<vmem>>, %arg12: memref<128x128xf32, #tpu.memory_space<vmem>>) attributes {dimension_semantics = [#tpu.dimension_semantics<parallel>, #tpu.dimension_semantics<arbitrary>], iteration_bounds = array<i64: 2, 2>, scalar_prefetch = 0 : i64, scratch_operands = 1 : i64, tpu.core_type = #tpu.core_type<tc>, window_params = [{transform_indices = @transform_0, window_bounds = array<i64: 128, 128>}, {transform_indices = @transform_1, window_bounds = array<i64: 128, 128>}, {transform_indices = @transform_2, window_bounds = array<i64: 128, 128>}, {transform_indices = @transform_3, window_bounds = array<i64: 128, 1>}, {pipeline_mode = #tpu.pipeline_mode<synchronous>, transform_indices = @transform_4, window_bounds = array<i64: 128, 128>}, {pipeline_mode = #tpu.pipeline_mode<synchronous>, transform_indices = @transform_5, window_bounds = array<i64: 128, 128>}, {pipeline_mode = #tpu.pipeline_mode<synchronous>, transform_indices = @transform_6, window_bounds = array<i64: 1, 128>}, {pipeline_mode = #tpu.pipeline_mode<synchronous>, transform_indices = @transform_7, window_bounds = array<i64: 1, 128>}, {pipeline_mode = #tpu.pipeline_mode<synchronous>, transform_indices = @transform_8, window_bounds = array<i64: 1, 128>}, {transform_indices = @transform_9, window_bounds = array<i64: 128, 128>}]} {
    %c0_i32 = arith.constant 0 : i32
    %0 = arith.cmpi eq, %arg1, %c0_i32 : i32
    %1 = arith.extui %0 : i1 to i32
    %c0_i32_0 = arith.constant 0 : i32
    %2 = arith.cmpi ne, %1, %c0_i32_0 : i32
    scf.if %2 {
      %cst_9 = arith.constant 0.000000e+00 : f32
      %12 = vector.broadcast %cst_9 : f32 to vector<128x128xf32>
      %c0_10 = arith.constant 0 : index
      %c0_11 = arith.constant 0 : index
      %13 = vector.load %arg12[%c0_10, %c0_11] : memref<128x128xf32, #tpu.memory_space<vmem>>, vector<128x128xf32>
      tpu.vector_store %arg12[%c0_10, %c0_11], %12 {strides = array<i32>} : memref<128x128xf32, #tpu.memory_space<vmem>>, vector<128x128xf32>,
    } else {
    }
    %c0 = arith.constant 0 : index
    %c0_1 = arith.constant 0 : index
    %3 = vector.load %arg12[%c0, %c0_1] : memref<128x128xf32, #tpu.memory_space<vmem>>, vector<128x128xf32>
    %c0_2 = arith.constant 0 : index
    %c0_3 = arith.constant 0 : index
    %4 = vector.load %arg2[%c0_2, %c0_3] : memref<128x128xbf16, #tpu.memory_space<vmem>>, vector<128x128xbf16>
    %c0_4 = arith.constant 0 : index
    %c0_5 = arith.constant 0 : index
    %5 = vector.load %arg3[%c0_4, %c0_5] : memref<128x128xbf16, #tpu.memory_space<vmem>>, vector<128x128xbf16>
    %cst = arith.constant dense<0.000000e+00> : vector<128x128xf32>
    %6 = tpu.matmul %4, %5, %cst {dimension_numbers = #tpu.dot_dimension_numbers<[1], [0], [0], [1], [0, 0, 1, 1], [], []>} : vector<128x128xbf16>, vector<128x128xbf16>, vector<128x128xf32> -> vector<128x128xf32>
    %7 = arith.addf %3, %6 : vector<128x128xf32>
    %c0_6 = arith.constant 0 : index
    %c0_7 = arith.constant 0 : index
    %8 = vector.load %arg12[%c0_6, %c0_7] : memref<128x128xf32, #tpu.memory_space<vmem>>, vector<128x128xf32>
    tpu.vector_store %arg12[%c0_6, %c0_7], %7 {strides = array<i32>} : memref<128x128xf32, #tpu.memory_space<vmem>>, vector<128x128xf32>,
    %c1_i32 = arith.constant 1 : i32
    %9 = arith.cmpi eq, %arg1, %c1_i32 : i32
    %10 = arith.extui %9 : i1 to i32
    %c0_i32_8 = arith.constant 0 : i32
    %11 = arith.cmpi ne, %10, %c0_i32_8 : i32
    scf.if %11 {
      %c0_9 = arith.constant 0 : index
      %c0_10 = arith.constant 0 : index
      %12 = vector.load %arg12[%c0_9, %c0_10] : memref<128x128xf32, #tpu.memory_space<vmem>>, vector<128x128xf32>
      %c0_11 = arith.constant 0 : index
      %c0_12 = arith.constant 0 : index
      %13 = vector.load %arg5[%c0_11, %c0_12] : memref<128x1xf32, #tpu.memory_space<vmem>>, vector<128x1xf32>
      %14 = vector.broadcast %13 : vector<128x1xf32> to vector<128x128xf32>
      %15 = arith.mulf %12, %14 : vector<128x128xf32>
      %16 = arith.truncf %15 : vector<128x128xf32> to vector<128x128xbf16>
      %c0_13 = arith.constant 0 : index
      %c0_14 = arith.constant 0 : index
      %17 = vector.load %arg6[%c0_13, %c0_14] : memref<128x128xbf16, #tpu.memory_space<vmem>>, vector<128x128xbf16>
      %cst_15 = arith.constant dense<0.000000e+00> : vector<128x128xf32>
      %18 = tpu.matmul %16, %17, %cst_15 {dimension_numbers = #tpu.dot_dimension_numbers<[1], [0], [0], [1], [0, 0, 1, 1], [], []>} : vector<128x128xbf16>, vector<128x128xbf16>, vector<128x128xf32> -> vector<128x128xf32>
      %c0_16 = arith.constant 0 : index
      %c0_17 = arith.constant 0 : index
      %19 = vector.load %arg4[%c0_16, %c0_17] : memref<128x128xbf16, #tpu.memory_space<vmem>>, vector<128x128xbf16>
      %c0_18 = arith.constant 0 : index
      %c0_19 = arith.constant 0 : index
      %20 = vector.load %arg7[%c0_18, %c0_19] : memref<128x128xbf16, #tpu.memory_space<vmem>>, vector<128x128xbf16>
      %cst_20 = arith.constant dense<0.000000e+00> : vector<128x128xf32>
      %21 = tpu.matmul %19, %20, %cst_20 {dimension_numbers = #tpu.dot_dimension_numbers<[1], [0], [0], [1], [0, 0, 1, 1], [], []>} : vector<128x128xbf16>, vector<128x128xbf16>, vector<128x128xf32> -> vector<128x128xf32>
      %22 = arith.addf %18, %21 : vector<128x128xf32>
      %c0_21 = arith.constant 0 : index
      %c0_22 = arith.constant 0 : index
      %23 = vector.load %arg8[%c0_21, %c0_22] : memref<1x128xf32, #tpu.memory_space<vmem>>, vector<1x128xf32>
      %24 = vector.broadcast %23 : vector<1x128xf32> to vector<128x128xf32>
      %25 = arith.addf %22, %24 : vector<128x128xf32>
      %c0_23 = arith.constant 0 : index
      %c0_24 = arith.constant 0 : index
      %26 = vector.load %arg9[%c0_23, %c0_24] : memref<1x128xf32, #tpu.memory_space<vmem>>, vector<1x128xf32>
      %27 = vector.broadcast %26 : vector<1x128xf32> to vector<128x128xf32>
      %28 = arith.mulf %25, %27 : vector<128x128xf32>
      %c0_25 = arith.constant 0 : index
      %c0_26 = arith.constant 0 : index
      %29 = vector.load %arg10[%c0_25, %c0_26] : memref<1x128xf32, #tpu.memory_space<vmem>>, vector<1x128xf32>
      %30 = vector.broadcast %29 : vector<1x128xf32> to vector<128x128xf32>
      %31 = arith.addf %28, %30 : vector<128x128xf32>
      %cst_27 = arith.constant 0.000000e+00 : f32
      %32 = vector.broadcast %cst_27 : f32 to vector<128x128xf32>
      %33 = arith.maximumf %31, %32 : vector<128x128xf32>
      %34 = arith.truncf %33 : vector<128x128xf32> to vector<128x128xbf16>
      %c0_28 = arith.constant 0 : index
      %c0_29 = arith.constant 0 : index
      %35 = vector.load %arg11[%c0_28, %c0_29] : memref<128x128xbf16, #tpu.memory_space<vmem>>, vector<128x128xbf16>
      tpu.vector_store %arg11[%c0_28, %c0_29], %34 {strides = array<i32>} : memref<128x128xbf16, #tpu.memory_space<vmem>>, vector<128x128xbf16>,
    } else {
    }
    return
  }
  func.func @transform_0(%arg0: i32, %arg1: i32) -> (i32, i32) {
    %c0_i32 = arith.constant 0 : i32
    return %arg0, %arg1 : i32, i32
  }
  func.func @transform_1(%arg0: i32, %arg1: i32) -> (i32, i32) {
    %c0_i32 = arith.constant 0 : i32
    %c0_i32_0 = arith.constant 0 : i32
    return %arg1, %c0_i32 : i32, i32
  }
  func.func @transform_2(%arg0: i32, %arg1: i32) -> (i32, i32) {
    %c0_i32 = arith.constant 0 : i32
    %c0_i32_0 = arith.constant 0 : i32
    return %arg0, %c0_i32 : i32, i32
  }
  func.func @transform_3(%arg0: i32, %arg1: i32) -> (i32, i32) {
    %c0_i32 = arith.constant 0 : i32
    %c0_i32_0 = arith.constant 0 : i32
    return %arg0, %c0_i32 : i32, i32
  }
  func.func @transform_4(%arg0: i32, %arg1: i32) -> (i32, i32) {
    %c0_i32 = arith.constant 0 : i32
    %c0_i32_0 = arith.constant 0 : i32
    %c0_i32_1 = arith.constant 0 : i32
    return %c0_i32, %c0_i32_0 : i32, i32
  }
  func.func @transform_5(%arg0: i32, %arg1: i32) -> (i32, i32) {
    %c0_i32 = arith.constant 0 : i32
    %c0_i32_0 = arith.constant 0 : i32
    %c0_i32_1 = arith.constant 0 : i32
    return %c0_i32, %c0_i32_0 : i32, i32
  }
  func.func @transform_6(%arg0: i32, %arg1: i32) -> (i32, i32) {
    %c0_i32 = arith.constant 0 : i32
    %c0_i32_0 = arith.constant 0 : i32
    %c0_i32_1 = arith.constant 0 : i32
    return %c0_i32, %c0_i32_0 : i32, i32
  }
  func.func @transform_7(%arg0: i32, %arg1: i32) -> (i32, i32) {
    %c0_i32 = arith.constant 0 : i32
    %c0_i32_0 = arith.constant 0 : i32
    %c0_i32_1 = arith.constant 0 : i32
    return %c0_i32, %c0_i32_0 : i32, i32
  }
  func.func @transform_8(%arg0: i32, %arg1: i32) -> (i32, i32) {
    %c0_i32 = arith.constant 0 : i32
    %c0_i32_0 = arith.constant 0 : i32
    %c0_i32_1 = arith.constant 0 : i32
    return %c0_i32, %c0_i32_0 : i32, i32
  }
  func.func @transform_9(%arg0: i32, %arg1: i32) -> (i32, i32) {
    %c0_i32 = arith.constant 0 : i32
    %c0_i32_0 = arith.constant 0 : i32
    return %arg0, %c0_i32 : i32, i32
  }
}

module attributes {stable_mosaic.version = 11 : i64} {
  func.func @_sage_layer_kernel(%arg0: i32, %arg1: i32, %arg2: memref<128x128xbf16, #tpu.memory_space<vmem>>, %arg3: memref<128x128xbf16, #tpu.memory_space<vmem>>, %arg4: memref<128x128xbf16, #tpu.memory_space<vmem>>, %arg5: memref<128x1xf32, #tpu.memory_space<vmem>>, %arg6: memref<128x128xbf16, #tpu.memory_space<vmem>>, %arg7: memref<128x128xbf16, #tpu.memory_space<vmem>>, %arg8: memref<1x128xf32, #tpu.memory_space<vmem>>, %arg9: memref<1x128xf32, #tpu.memory_space<vmem>>, %arg10: memref<1x128xf32, #tpu.memory_space<vmem>>, %arg11: memref<128x128xf32, #tpu.memory_space<vmem>>, %arg12: memref<128x128xf32, #tpu.memory_space<vmem>>) attributes {dimension_semantics = [#tpu.dimension_semantics<parallel>, #tpu.dimension_semantics<arbitrary>], iteration_bounds = array<i64: 2, 2>, scalar_prefetch = 0 : i64, scratch_operands = 1 : i64, tpu.core_type = #tpu.core_type<tc>, window_params = [{transform_indices = @transform_0, window_bounds = array<i64: 128, 128>}, {transform_indices = @transform_1, window_bounds = array<i64: 128, 128>}, {transform_indices = @transform_2, window_bounds = array<i64: 128, 128>}, {transform_indices = @transform_3, window_bounds = array<i64: 128, 1>}, {pipeline_mode = #tpu.pipeline_mode<synchronous>, transform_indices = @transform_4, window_bounds = array<i64: 128, 128>}, {pipeline_mode = #tpu.pipeline_mode<synchronous>, transform_indices = @transform_5, window_bounds = array<i64: 128, 128>}, {pipeline_mode = #tpu.pipeline_mode<synchronous>, transform_indices = @transform_6, window_bounds = array<i64: 1, 128>}, {pipeline_mode = #tpu.pipeline_mode<synchronous>, transform_indices = @transform_7, window_bounds = array<i64: 1, 128>}, {pipeline_mode = #tpu.pipeline_mode<synchronous>, transform_indices = @transform_8, window_bounds = array<i64: 1, 128>}, {transform_indices = @transform_9, window_bounds = array<i64: 128, 128>}]} {
    %c0_i32 = arith.constant 0 : i32
    %0 = arith.cmpi eq, %arg1, %c0_i32 : i32
    %1 = arith.extui %0 : i1 to i32
    %c0_i32_0 = arith.constant 0 : i32
    %2 = arith.cmpi ne, %1, %c0_i32_0 : i32
    scf.if %2 {
      %cst_9 = arith.constant 0.000000e+00 : f32
      %12 = vector.broadcast %cst_9 : f32 to vector<128x128xf32>
      %c0_10 = arith.constant 0 : index
      %c0_11 = arith.constant 0 : index
      %13 = vector.load %arg12[%c0_10, %c0_11] : memref<128x128xf32, #tpu.memory_space<vmem>>, vector<128x128xf32>
      tpu.vector_store %arg12[%c0_10, %c0_11], %12 {strides = array<i32>} : memref<128x128xf32, #tpu.memory_space<vmem>>, vector<128x128xf32>,
    } else {
    }
    %c0 = arith.constant 0 : index
    %c0_1 = arith.constant 0 : index
    %3 = vector.load %arg12[%c0, %c0_1] : memref<128x128xf32, #tpu.memory_space<vmem>>, vector<128x128xf32>
    %c0_2 = arith.constant 0 : index
    %c0_3 = arith.constant 0 : index
    %4 = vector.load %arg2[%c0_2, %c0_3] : memref<128x128xbf16, #tpu.memory_space<vmem>>, vector<128x128xbf16>
    %c0_4 = arith.constant 0 : index
    %c0_5 = arith.constant 0 : index
    %5 = vector.load %arg3[%c0_4, %c0_5] : memref<128x128xbf16, #tpu.memory_space<vmem>>, vector<128x128xbf16>
    %cst = arith.constant dense<0.000000e+00> : vector<128x128xf32>
    %6 = tpu.matmul %4, %5, %cst {dimension_numbers = #tpu.dot_dimension_numbers<[1], [0], [0], [1], [0, 0, 1, 1], [], []>} : vector<128x128xbf16>, vector<128x128xbf16>, vector<128x128xf32> -> vector<128x128xf32>
    %7 = arith.addf %3, %6 : vector<128x128xf32>
    %c0_6 = arith.constant 0 : index
    %c0_7 = arith.constant 0 : index
    %8 = vector.load %arg12[%c0_6, %c0_7] : memref<128x128xf32, #tpu.memory_space<vmem>>, vector<128x128xf32>
    tpu.vector_store %arg12[%c0_6, %c0_7], %7 {strides = array<i32>} : memref<128x128xf32, #tpu.memory_space<vmem>>, vector<128x128xf32>,
    %c1_i32 = arith.constant 1 : i32
    %9 = arith.cmpi eq, %arg1, %c1_i32 : i32
    %10 = arith.extui %9 : i1 to i32
    %c0_i32_8 = arith.constant 0 : i32
    %11 = arith.cmpi ne, %10, %c0_i32_8 : i32
    scf.if %11 {
      %c0_9 = arith.constant 0 : index
      %c0_10 = arith.constant 0 : index
      %12 = vector.load %arg12[%c0_9, %c0_10] : memref<128x128xf32, #tpu.memory_space<vmem>>, vector<128x128xf32>
      %c0_11 = arith.constant 0 : index
      %c0_12 = arith.constant 0 : index
      %13 = vector.load %arg5[%c0_11, %c0_12] : memref<128x1xf32, #tpu.memory_space<vmem>>, vector<128x1xf32>
      %14 = vector.broadcast %13 : vector<128x1xf32> to vector<128x128xf32>
      %15 = arith.mulf %12, %14 : vector<128x128xf32>
      %16 = arith.truncf %15 : vector<128x128xf32> to vector<128x128xbf16>
      %c0_13 = arith.constant 0 : index
      %c0_14 = arith.constant 0 : index
      %17 = vector.load %arg6[%c0_13, %c0_14] : memref<128x128xbf16, #tpu.memory_space<vmem>>, vector<128x128xbf16>
      %cst_15 = arith.constant dense<0.000000e+00> : vector<128x128xf32>
      %18 = tpu.matmul %16, %17, %cst_15 {dimension_numbers = #tpu.dot_dimension_numbers<[1], [0], [0], [1], [0, 0, 1, 1], [], []>} : vector<128x128xbf16>, vector<128x128xbf16>, vector<128x128xf32> -> vector<128x128xf32>
      %c0_16 = arith.constant 0 : index
      %c0_17 = arith.constant 0 : index
      %19 = vector.load %arg4[%c0_16, %c0_17] : memref<128x128xbf16, #tpu.memory_space<vmem>>, vector<128x128xbf16>
      %c0_18 = arith.constant 0 : index
      %c0_19 = arith.constant 0 : index
      %20 = vector.load %arg7[%c0_18, %c0_19] : memref<128x128xbf16, #tpu.memory_space<vmem>>, vector<128x128xbf16>
      %cst_20 = arith.constant dense<0.000000e+00> : vector<128x128xf32>
      %21 = tpu.matmul %19, %20, %cst_20 {dimension_numbers = #tpu.dot_dimension_numbers<[1], [0], [0], [1], [0, 0, 1, 1], [], []>} : vector<128x128xbf16>, vector<128x128xbf16>, vector<128x128xf32> -> vector<128x128xf32>
      %22 = arith.addf %18, %21 : vector<128x128xf32>
      %c0_21 = arith.constant 0 : index
      %c0_22 = arith.constant 0 : index
      %23 = vector.load %arg8[%c0_21, %c0_22] : memref<1x128xf32, #tpu.memory_space<vmem>>, vector<1x128xf32>
      %24 = vector.broadcast %23 : vector<1x128xf32> to vector<128x128xf32>
      %25 = arith.addf %22, %24 : vector<128x128xf32>
      %26 = tpu.iota {dimensions = array<i32: 1>} : vector<128x128xi32>
      %c8_i32 = arith.constant 8 : i32
      %27 = vector.broadcast %c8_i32 : i32 to vector<128x128xi32>
      %28 = arith.cmpi slt, %26, %27 : vector<128x128xi32>
      %cst_23 = arith.constant -1.000000e+30 : f32
      %29 = vector.broadcast %cst_23 : f32 to vector<128x128xf32>
      %30 = arith.select %28, %25, %29 : vector<128x128xi1>, vector<128x128xf32>
      %cst_24 = arith.constant dense<0xFF800000> : vector<128xf32>
      %31 = vector.multi_reduction <maximumf>, %30, %cst_24 [1] : vector<128x128xf32> to vector<128xf32>
      %32 = vector.shape_cast %31 : vector<128xf32> to vector<128x1xf32>
      %33 = vector.broadcast %32 : vector<128x1xf32> to vector<128x128xf32>
      %34 = arith.subf %30, %33 : vector<128x128xf32>
      %35 = math.exp %34 : vector<128x128xf32>
      %cst_25 = arith.constant dense<0.000000e+00> : vector<128xf32>
      %36 = vector.multi_reduction <add>, %35, %cst_25 [1] : vector<128x128xf32> to vector<128xf32>
      %37 = vector.shape_cast %36 : vector<128xf32> to vector<128x1xf32>
      %38 = math.log %37 : vector<128x1xf32>
      %39 = vector.broadcast %38 : vector<128x1xf32> to vector<128x128xf32>
      %40 = arith.subf %34, %39 : vector<128x128xf32>
      %c0_26 = arith.constant 0 : index
      %c0_27 = arith.constant 0 : index
      %41 = vector.load %arg11[%c0_26, %c0_27] : memref<128x128xf32, #tpu.memory_space<vmem>>, vector<128x128xf32>
      tpu.vector_store %arg11[%c0_26, %c0_27], %40 {strides = array<i32>} : memref<128x128xf32, #tpu.memory_space<vmem>>, vector<128x128xf32>,
    } else {
    }
    return
  }
  func.func @transform_0(%arg0: i32, %arg1: i32) -> (i32, i32) {
    %c0_i32 = arith.constant 0 : i32
    return %arg0, %arg1 : i32, i32
  }
  func.func @transform_1(%arg0: i32, %arg1: i32) -> (i32, i32) {
    %c0_i32 = arith.constant 0 : i32
    %c0_i32_0 = arith.constant 0 : i32
    return %arg1, %c0_i32 : i32, i32
  }
  func.func @transform_2(%arg0: i32, %arg1: i32) -> (i32, i32) {
    %c0_i32 = arith.constant 0 : i32
    %c0_i32_0 = arith.constant 0 : i32
    return %arg0, %c0_i32 : i32, i32
  }
  func.func @transform_3(%arg0: i32, %arg1: i32) -> (i32, i32) {
    %c0_i32 = arith.constant 0 : i32
    %c0_i32_0 = arith.constant 0 : i32
    return %arg0, %c0_i32 : i32, i32
  }
  func.func @transform_4(%arg0: i32, %arg1: i32) -> (i32, i32) {
    %c0_i32 = arith.constant 0 : i32
    %c0_i32_0 = arith.constant 0 : i32
    %c0_i32_1 = arith.constant 0 : i32
    return %c0_i32, %c0_i32_0 : i32, i32
  }
  func.func @transform_5(%arg0: i32, %arg1: i32) -> (i32, i32) {
    %c0_i32 = arith.constant 0 : i32
    %c0_i32_0 = arith.constant 0 : i32
    %c0_i32_1 = arith.constant 0 : i32
    return %c0_i32, %c0_i32_0 : i32, i32
  }
  func.func @transform_6(%arg0: i32, %arg1: i32) -> (i32, i32) {
    %c0_i32 = arith.constant 0 : i32
    %c0_i32_0 = arith.constant 0 : i32
    %c0_i32_1 = arith.constant 0 : i32
    return %c0_i32, %c0_i32_0 : i32, i32
  }
  func.func @transform_7(%arg0: i32, %arg1: i32) -> (i32, i32) {
    %c0_i32 = arith.constant 0 : i32
    %c0_i32_0 = arith.constant 0 : i32
    %c0_i32_1 = arith.constant 0 : i32
    return %c0_i32, %c0_i32_0 : i32, i32
  }
  func.func @transform_8(%arg0: i32, %arg1: i32) -> (i32, i32) {
    %c0_i32 = arith.constant 0 : i32
    %c0_i32_0 = arith.constant 0 : i32
    %c0_i32_1 = arith.constant 0 : i32
    return %c0_i32, %c0_i32_0 : i32, i32
  }
  func.func @transform_9(%arg0: i32, %arg1: i32) -> (i32, i32) {
    %c0_i32 = arith.constant 0 : i32
    %c0_i32_0 = arith.constant 0 : i32
    return %arg0, %c0_i32 : i32, i32
  }
}

</mosaic_0001>

<bundles_post_ra>
// kernel: sage_forward.3
= control target key start
LH: loop header
LB: loop body
LE: loop exit
PB: predicated region body
PF: predicated region fallthrough
CT: control target
= control target key end

     0   :  { %s2418_s0 = inlined_call_operand.vmem [shape: bf16[256,256], index: 0, kind: input, shape index: {}]   ;;  %s2419_s1 = inlined_call_operand.vmem [shape: bf16[256,128], index: 1, kind: input, shape index: {}, may-alias: {1,2}]   ;;  %s2420_s2 = inlined_call_operand.vmem [shape: bf16[256,128], index: 2, kind: input, shape index: {}, may-alias: {1,2}]   ;;  %s2421_s3 = inlined_call_operand.vmem [shape: f32[256,1], index: 3, kind: input, shape index: {}]   ;;  %s2422_s4 = inlined_call_operand.vmem [shape: bf16[128,128], index: 4, kind: input, shape index: {}]   ;;  %s2423_s5 = inlined_call_operand.vmem [shape: bf16[128,128], index: 5, kind: input, shape index: {}]   ;;  %s2424_s6 = inlined_call_operand.vmem [shape: f32[1,128], index: 6, kind: input, shape index: {}]   ;;  %s2425_s7 = inlined_call_operand.vmem [shape: f32[1,128], index: 7, kind: input, shape index: {}]   ;;  %s2426_s8 = inlined_call_operand.vmem [shape: f32[1,128], index: 8, kind: input, shape index: {}]   ;;  %s2427_s9 = inlined_call_operand.vmem [shape: bf16[256,128], index: 9, kind: output, shape index: {}]  }
   0x1   :  { %2431 = sst [smem:[#allocation7_spill]] %s2418_s0 }
   0x2   :  { %s2131_s30 = smov 0   ;;  %s2133_s10 = smov 0  }
   0x3   :  { %s2135_s11 = smov 0   ;;  %s2137_s12 = smov 0  }
   0x4   :  { %s2139_s13 = smov 0   ;;  %s2141_s14 = smov 0  }
   0x5   :  { %s2143_s15 = smov 0  }
   0x6 LB: > { %2432 = sst [smem:[#allocation4_spill]] %s2073_s14  ;;  %s28_s16 = sadd.s32 1, %s2069_s13  ;;  %s2077_s15 = sphi %s2143_s15, %s19_s15   ;;  %s2073_s14 = sphi %s2141_s14, %s2438_s14   ;;  %s2069_s13 = sphi %s2139_s13, %s2442_s13   ;;  %s2065_s12 = sphi %s2137_s12, %s2436_s12   ;;  %s2061_s11 = sphi %s2135_s11, %s2441_s11   ;;  %s2057_s10 = sphi %s2133_s10, %s2440_s10   ;;  %s2053_s30 = sphi %s2131_s30, %s2439_s30  }
   0x7   : > { %p29_p0 = scmp.ge.s32.totalorder %s28_s16, 2  ;;  %s31_s17 = sadd.s32 1, %s2073_s14 }
   0x8   : > { %p47_p1 = scmp.ne.s32.totalorder %s2057_s10, %s2053_s30  ;;  %p48_p2 = scmp.eq.s32.totalorder %s2077_s15, 0 }
   0x9   : > { %s2444_s16 = smov (%p29_p0, %s28_s16), 0  ;;  %s2446_s17 = smov (!%p29_p0, %s31_s17), %s2073_s14 }
   0xa   : > { %2433 = sst [smem:[#allocation5_spill]] %s2444_s16  ;;  %p49_p3 = por %p48_p2, %p47_p1 }
   0xb   : > { %p33_p4 = scmp.ge.s32.totalorder %s2446_s17, 2  ;;  %s36_s18 = ssub.s32 %s2069_s13, %s2444_s16 }
   0xc   : > { %s40_s21 = sadd.s32 1, %s2057_s10  ;;  %p1621_p6 = scmp.ge.s32.totalorder %s2077_s15, 4 }
   0xd   : > { %s2448_s17 = smov (%p33_p4, %s2446_s17), 0 }
   0xe   : > { %2434 = sst [smem:[#allocation6_spill]] %s2448_s17  ;;  %s35_s19 = ssub.s32 %s2073_s14, %s2448_s17 }
   0xf   : > { %s37_s20 = sor.u32 %s36_s18, %s35_s19  ;;  %297 = sbr.rel (%p1621_p6) target bundleno = 40 (0x28), region = 36 }
  0x10   : > { %p38_p5 = scmp.eq.s32.totalorder %s37_s20, 0 }
  0x12   : > { %s2182_s22 = scalar_select %p38_p5, %s2057_s10, %s40_s21  }
  0x14   : > { %300 = sbr.rel (!%p49_p3) target bundleno = 40 (0x28), region = 40  ;;  %s302_s23 = sand.u32 (%p49_p3), 1, %s2057_s10  }
  0x15   : > { %s1699_s24 = sshll.u32 (%p49_p3), %s2073_s14, 5  ;;  %s1622_s25 = sshll.u32 (%p49_p3), %s302_s23, 6 }
  0x16   : > { %s307_s26 = sadd.s32 (%p49_p3), %s2069_s13, %s1699_s24  ;;  %s2435_s0 = sld [smem:[#allocation7_spill]] (%p49_p3) }
  0x17   : > { %s1625_s27 = sshll.u32 (%p49_p3), %s307_s26, 2  ;;  %s304_s19 = scalar_lea.vmem (%p49_p3), [#allocation3], %s1622_s25 }
  0x1c   : > { %s2191_s18 = scalar_lea.vmem %s2435_s0, %s1625_s27 }
  0x1d   : > { %v326_v0 = vld [vmem:[%s2191_s18] sm:$0xf]  ;;  %v328_v1 = vld [vmem:[%s2191_s18 + $0x8] sm:$0xf]  ;;  %v330_v2 = vld [vmem:[%s2191_s18 + $0x10] sm:$0xf] }
  0x1e   : > { %327 = vst [vmem:[%s304_s19] sm:$0xf] %v326_v0  ;;  %329 = vst [vmem:[%s304_s19 + $0x4] sm:$0xf] %v328_v1  ;;  %v332_v3 = vld [vmem:[%s2191_s18 + $0x18] sm:$0xf] }
  0x1f   : > { %331 = vst [vmem:[%s304_s19 + $0x8] sm:$0xf] %v330_v2  ;;  %v334_v4 = vld [vmem:[%s2191_s18 + $0x20] sm:$0xf]  ;;  %v336_v5 = vld [vmem:[%s2191_s18 + $0x28] sm:$0xf] }
  0x20   : > { %333 = vst [vmem:[%s304_s19 + $0xc] sm:$0xf] %v332_v3  ;;  %335 = vst [vmem:[%s304_s19 + $0x10] sm:$0xf] %v334_v4  ;;  %v338_v6 = vld [vmem:[%s2191_s18 + $0x30] sm:$0xf] }
  0x21   : > { %337 = vst [vmem:[%s304_s19 + $0x14] sm:$0xf] %v336_v5  ;;  %v340_v7 = vld [vmem:[%s2191_s18 + $0x38] sm:$0xf]  ;;  %v342_v8 = vld [vmem:[%s2191_s18 + $0x40] sm:$0xf] }
  0x22   : > { %339 = vst [vmem:[%s304_s19 + $0x18] sm:$0xf] %v338_v6  ;;  %341 = vst [vmem:[%s304_s19 + $0x1c] sm:$0xf] %v340_v7  ;;  %v344_v9 = vld [vmem:[%s2191_s18 + $0x48] sm:$0xf] }
  0x23   : > { %343 = vst [vmem:[%s304_s19 + $0x20] sm:$0xf] %v342_v8  ;;  %v346_v10 = vld [vmem:[%s2191_s18 + $0x50] sm:$0xf]  ;;  %v348_v11 = vld [vmem:[%s2191_s18 + $0x58] sm:$0xf] }
  0x24   : > { %345 = vst [vmem:[%s304_s19 + $0x24] sm:$0xf] %v344_v9  ;;  %347 = vst [vmem:[%s304_s19 + $0x28] sm:$0xf] %v346_v10  ;;  %v350_v12 = vld [vmem:[%s2191_s18 + $0x60] sm:$0xf] }
  0x25   : > { %349 = vst [vmem:[%s304_s19 + $0x2c] sm:$0xf] %v348_v11  ;;  %v352_v13 = vld [vmem:[%s2191_s18 + $0x68] sm:$0xf]  ;;  %v354_v14 = vld [vmem:[%s2191_s18 + $0x70] sm:$0xf] }
  0x26   : > { %351 = vst [vmem:[%s304_s19 + $0x30] sm:$0xf] %v350_v12  ;;  %353 = vst [vmem:[%s304_s19 + $0x34] sm:$0xf] %v352_v13  ;;  %v356_v15 = vld [vmem:[%s2191_s18 + $0x78] sm:$0xf] }
  0x27   : > { %355 = vst [vmem:[%s304_s19 + $0x38] sm:$0xf] %v354_v14  ;;  %357 = vst [vmem:[%s304_s19 + $0x3c] sm:$0xf] %v356_v15 }
  0x28 PF: > { %p1626_p7 = scmp.ge.s32.totalorder %s2077_s15, 1  ;;  %p439_p8 = scmp.lt.s32.totalorder %s2077_s15, 5 }
  0x2a   : > { %p440_p9 = pnand %p1626_p7, %p439_p8 }
  0x2b   : > { %s446_s20 = sand.u32 (!%p440_p9), 1, %s2053_s30   ;;  %s1628_s21 = sshll.u32 (!%p440_p9), %s2061_s11, 4 }
  0x2c   : > { %443 = sbr.rel (%p440_p9) target bundleno = 682 (0x2aa), region = 93  ;;  %s1627_s23 = sshll.u32 (!%p440_p9), %s446_s20, 6 }
  0x2d   : > { %p498_p10 = scmp.lt.s32.totalorder (!%p440_p9), %s1628_s21, 31  ;;  %s1630_s24 = sshll.u32 (!%p440_p9), %s2065_s12, 4 }
  0x2e   : > { %p504_p11 = scmp.lt.s32.totalorder (!%p440_p9), %s1630_s24, 31  ;;  %p1636_p12 = scmp.ne.s32.totalorder (!%p440_p9), %s2061_s11, 0 }
  0x31   : > { %s2450_s21 = smov (!%p498_p10, %s1628_s21), 31  ;;  %s2452_s24 = smov (!%p504_p11, %s1630_s24), 31 }
  0x32   : > { %s1629_s25 = sshll.u32 %s2450_s21, 2  ;;  %s1631_s29 = sshll.u32 %s2452_s24, 2 }
  0x33   : > { %s2217_s28 = scalar_lea.vmem %s2419_s1, %s1629_s25  ;;  %s1633_s18 = sshll.u32 %s2452_s24, 3 }
  0x34   : > { %s2222_s17 = scalar_lea.vmem %s2420_s2, %s1631_s29  ;;  %s2227_s12 = scalar_lea.vmem %s2421_s3, %s1633_s18 }
  0x35   : > { %s2232_s14 = scalar_lea.vmem %s2427_s9, %s1631_s29  ;;  %s2234_s25 = scalar_lea.vmem [#allocation3], %s1627_s23 }
  0x36   : > { %525 = sbr.rel (%p1636_p12) target bundleno = 68 (0x44), region = 101 }
  0x3b   : > { %v2079_v16 = vmov 0.0  }
  0x3c   : > { %526 = vst [vmem:[#allocation2 + $0x30] sm:$0xff] %v2079_v16  ;;  %527 = vst [vmem:[#allocation2] sm:$0xff] %v2079_v16 }
  0x3d   : > { %528 = vst [vmem:[#allocation2 + $0x58] sm:$0xff] %v2079_v16  ;;  %529 = vst [vmem:[#allocation2 + $0x18] sm:$0xff] %v2079_v16 }
  0x3e   : > { %530 = vst [vmem:[#allocation2 + $0x50] sm:$0xff] %v2079_v16  ;;  %531 = vst [vmem:[#allocation2 + $0x68] sm:$0xff] %v2079_v16 }
  0x3f   : > { %532 = vst [vmem:[#allocation2 + $0x8] sm:$0xff] %v2079_v16  ;;  %533 = vst [vmem:[#allocation2 + $0x48] sm:$0xff] %v2079_v16 }
  0x40   : > { %534 = vst [vmem:[#allocation2 + $0x40] sm:$0xff] %v2079_v16  ;;  %535 = vst [vmem:[#allocation2 + $0x20] sm:$0xff] %v2079_v16 }
  0x41   : > { %536 = vst [vmem:[#allocation2 + $0x10] sm:$0xff] %v2079_v16  ;;  %537 = vst [vmem:[#allocation2 + $0x38] sm:$0xff] %v2079_v16 }
  0x42   : > { %538 = vst [vmem:[#allocation2 + $0x60] sm:$0xff] %v2079_v16  ;;  %539 = vst [vmem:[#allocation2 + $0x70] sm:$0xff] %v2079_v16 }
  0x43   : > { %540 = vst [vmem:[#allocation2 + $0x78] sm:$0xff] %v2079_v16  ;;  %541 = vst [vmem:[#allocation2 + $0x28] sm:$0xff] %v2079_v16 }
  0x44 PF: > { %v1981_v17 = vld [vmem:[%s2217_s28 + $0x38] sm:$0xff]   ;;  %v1982_v18 = vld [vmem:[%s2217_s28 + $0x30] sm:$0xff]   ;;  %v1983_v19 = vld [vmem:[%s2217_s28 + $0x28] sm:$0xff]   ;;  %p1653_p13 = scmp.ne.s32.totalorder %s2061_s11, 1 }
  0x45   : > { %1811 = vmatprep.subr.bf16.mxu0 %v1981_v17  ;;  %1907 = vmatprep.subr.bf16.mxu1 %v1981_v17  ;;  %v1984_v20 = vld [vmem:[%s2217_s28 + $0x20] sm:$0xff]   ;;  %v1985_v23 = vld [vmem:[%s2217_s28 + $0x18] sm:$0xff]   ;;  %v1986_v24 = vld [vmem:[%s2217_s28 + $0x10] sm:$0xff]  }
  0x46   : > { %1812 = vmatpush3.bf16.msra.mxu0 %v1981_v17  ;;  %1915 = vmatpush3.bf16.msra.mxu1 %v1981_v17  ;;  %v1989_v21 = vld [vmem:[%s2234_s25] sm:$0xff]   ;;  %v1987_v25 = vld [vmem:[%s2217_s28 + $0x8] sm:$0xff]   ;;  %v1993_v29 = vld [vmem:[%s2234_s25 + $0x10] sm:$0xff]  }
  0x47   : > { %1813 = vmatprep.subr.bf16.mxu0 %v1982_v18  ;;  %1908 = vmatprep.subr.bf16.mxu1 %v1982_v18  ;;  %v1990_v22 = vld [vmem:[%s2234_s25 + $0x20] sm:$0xff]   ;;  %v1991_v27 = vld [vmem:[%s2234_s25 + $0x8] sm:$0xff]   ;;  %v1994_v30 = vld [vmem:[%s2234_s25 + $0x30] sm:$0xff]  }
  0x48   : > { %1827 = vmatprep.mubr.bf16.mxu0 %v1989_v21  ;;  %1835 = vmatprep.mubr.bf16.mxu1 %v1990_v22  ;;  %v1988_v26 = vld [vmem:[%s2217_s28] sm:$0xff]   ;;  %v1992_v28 = vld [vmem:[%s2234_s25 + $0x28] sm:$0xff]   ;;  %v1995_v31 = vld [vmem:[%s2234_s25 + $0x18] sm:$0xff]  }
  0x49   : > { %v1996_v32 = vld [vmem:[%s2234_s25 + $0x38] sm:$0xff]   ;;  %v552_v34 = vld [vmem:[#allocation2 + $0x10] sm:$0xff]  ;;  %v550_v38 = vld [vmem:[#allocation2 + $0x40] sm:$0xff] }
  0x4a   : > { %1814 = vmatpush3.bf16.msra.mxu0 %v1982_v18  ;;  %1916 = vmatpush3.bf16.msra.mxu1 %v1982_v18  ;;  %v544_v33 = vld [vmem:[#allocation2 + $0x58] sm:$0xff]  ;;  %v542_v37 = vld [vmem:[#allocation2 + $0x30] sm:$0xff]  ;;  %v543_v49 = vld [vmem:[#allocation2] sm:$0xff] }
  0x4b   : > { %1815 = vmatprep.subr.bf16.mxu0 %v1983_v19  ;;  %1909 = vmatprep.subr.bf16.mxu1 %v1983_v19  ;;  %v545_v43 = vld [vmem:[#allocation2 + $0x18] sm:$0xff]  ;;  %v551_v50 = vld [vmem:[#allocation2 + $0x20] sm:$0xff]  ;;  %v548_v55 = vld [vmem:[#allocation2 + $0x8] sm:$0xff] }
  0x4c   : > { %v553_v44 = vld [vmem:[#allocation2 + $0x38] sm:$0xff]  ;;  %v546_v61 = vld [vmem:[#allocation2 + $0x50] sm:$0xff]  ;;  %v554_v62 = vld [vmem:[#allocation2 + $0x60] sm:$0xff] }
  0x4d   : > { %v556_v56 = vld [vmem:[#allocation2 + $0x78] sm:$0xff]  ;;  %v549_v3 = vld [vmem:[#allocation2 + $0x48] sm:$0xff]  ;;  %v555_v10 = vld [vmem:[#allocation2 + $0x70] sm:$0xff] }
  0x4e   : > { %1816 = vmatpush3.bf16.msra.mxu0 %v1983_v19  ;;  %1917 = vmatpush3.bf16.msra.mxu1 %v1983_v19  ;;  %v557_v4 = vld [vmem:[#allocation2 + $0x28] sm:$0xff] }
  0x4f   : > { %1817 = vmatprep.subr.bf16.mxu0 %v1984_v20  ;;  %1910 = vmatprep.subr.bf16.mxu1 %v1984_v20  ;;  %v547_v9 = vld [vmem:[#allocation2 + $0x68] sm:$0xff] }
  0x52   : > { %1818 = vmatpush3.bf16.msra.mxu0 %v1984_v20  ;;  %1918 = vmatpush3.bf16.msra.mxu1 %v1984_v20 }
  0x53   : > { %1819 = vmatprep.subr.bf16.mxu0 %v1985_v23  ;;  %1911 = vmatprep.subr.bf16.mxu1 %v1985_v23 }
  0x56   : > { %1820 = vmatpush3.bf16.msra.mxu0 %v1985_v23  ;;  %1919 = vmatpush3.bf16.msra.mxu1 %v1985_v23 }
  0x57   : > { %1821 = vmatprep.subr.bf16.mxu0 %v1986_v24  ;;  %1912 = vmatprep.subr.bf16.mxu1 %v1986_v24 }
  0x5a   : > { %1822 = vmatpush3.bf16.msra.mxu0 %v1986_v24  ;;  %1920 = vmatpush3.bf16.msra.mxu1 %v1986_v24 }
  0x5b   : > { %1823 = vmatprep.subr.bf16.mxu0 %v1987_v25  ;;  %1913 = vmatprep.subr.bf16.mxu1 %v1987_v25 }
  0x5e   : > { %1824 = vmatpush3.bf16.msra.mxu0 %v1987_v25  ;;  %1921 = vmatpush3.bf16.msra.mxu1 %v1987_v25 }
  0x5f   : > { %1825 = vmatprep.subr.bf16.mxu0 %v1988_v26  ;;  %1914 = vmatprep.subr.bf16.mxu1 %v1988_v26 }
  0x62   : > { %1826 = vmatpush3.bf16.msra.mxu0 %v1988_v26  ;;  %1922 = vmatpush3.bf16.msra.mxu1 %v1988_v26 }
  0x65   : > { %1828 = vmatmul.mubr.bf16.vlgmr.msra.gmra.mxu0 %v1991_v27  ;;  %1836 = vmatmul.mubr.bf16.vlgmr.msra.gmra.mxu1 %v1992_v28 }
  0x66   : > { %1831 = vmatprep.mubr.bf16.mxu0 %v1993_v29  ;;  %1839 = vmatprep.mubr.bf16.mxu1 %v1994_v30 }
  0x6d   : > { %1832 = vmatmul.mubr.bf16.gmra.mxu0 %v1995_v31  ;;  %1840 = vmatmul.mubr.bf16.gmra.mxu1 %v1996_v32 }
 0x125   : > { %v1829_v35 = vpop.f32.mrf.mxu0  ;;  %v1837_v36 = vpop.f32.mrf.mxu1 }
 0x126   : > { %v785_v39 = vadd.f32 %v1829_v35, %v544_v33  ;;  %v793_v40 = vadd.f32 %v1837_v36, %v552_v34 }
 0x127   : > { %v720_v41 = vpop.f32.mrf.mxu0  ;;  %v752_v42 = vpop.f32.mrf.mxu1 }
 0x128   : > { %801 = vst [vmem:[#allocation2 + $0x58] sm:$0xff] %v785_v39  ;;  %809 = vst [vmem:[#allocation2 + $0x10] sm:$0xff] %v793_v40  ;;  %v783_v45 = vadd.f32 %v720_v41, %v542_v37  ;;  %v791_v46 = vadd.f32 %v752_v42, %v550_v38 }
 0x129   : > { %v1830_v47 = vpop.f32.mrf.mxu0  ;;  %v1838_v48 = vpop.f32.mrf.mxu1 }
 0x12a   : > { %799 = vst [vmem:[#allocation2 + $0x30] sm:$0xff] %v783_v45  ;;  %807 = vst [vmem:[#allocation2 + $0x40] sm:$0xff] %v791_v46  ;;  %v786_v51 = vadd.f32 %v1830_v47, %v545_v43  ;;  %v794_v52 = vadd.f32 %v1838_v48, %v553_v44 }
 0x12b   : > { %v723_v53 = vpop.f32.mrf.mxu0  ;;  %v755_v54 = vpop.f32.mrf.mxu1 }
 0x12c   : > { %802 = vst [vmem:[#allocation2 + $0x18] sm:$0xff] %v786_v51  ;;  %810 = vst [vmem:[#allocation2 + $0x38] sm:$0xff] %v794_v52  ;;  %v784_v57 = vadd.f32 %v723_v53, %v543_v49  ;;  %v792_v58 = vadd.f32 %v755_v54, %v551_v50 }
 0x12d   : > { %v1833_v59 = vpop.f32.mrf.mxu0  ;;  %v1841_v60 = vpop.f32.mrf.mxu1 }
 0x12e   : > { %800 = vst [vmem:[#allocation2] sm:$0xff] %v784_v57  ;;  %808 = vst [vmem:[#allocation2 + $0x20] sm:$0xff] %v792_v58  ;;  %v789_v63 = vadd.f32 %v1833_v59, %v548_v55  ;;  %v797_v0 = vadd.f32 %v1841_v60, %v556_v56 }
 0x12f   : > { %v736_v1 = vpop.f32.mrf.mxu0  ;;  %v768_v2 = vpop.f32.mrf.mxu1 }
 0x130   : > { %805 = vst [vmem:[#allocation2 + $0x8] sm:$0xff] %v789_v63  ;;  %813 = vst [vmem:[#allocation2 + $0x78] sm:$0xff] %v797_v0  ;;  %v787_v5 = vadd.f32 %v736_v1, %v546_v61  ;;  %v795_v6 = vadd.f32 %v768_v2, %v554_v62 }
 0x131   : > { %v1834_v7 = vpop.f32.mrf.mxu0  ;;  %v1842_v8 = vpop.f32.mrf.mxu1 }
 0x132   : > { %803 = vst [vmem:[#allocation2 + $0x50] sm:$0xff] %v787_v5  ;;  %811 = vst [vmem:[#allocation2 + $0x60] sm:$0xff] %v795_v6  ;;  %v790_v11 = vadd.f32 %v1834_v7, %v549_v3  ;;  %v798_v12 = vadd.f32 %v1842_v8, %v557_v4  ;;  %818 = sbr.rel (%p1653_p13) target bundleno = 682 (0x2aa), region = 105 }
 0x133   : > { %v739_v13 = vpop.f32.mrf.mxu0  ;;  %v771_v14 = vpop.f32.mrf.mxu1 }
 0x134   : > { %806 = vst [vmem:[#allocation2 + $0x48] sm:$0xff] %v790_v11  ;;  %814 = vst [vmem:[#allocation2 + $0x28] sm:$0xff] %v798_v12  ;;  %v788_v15 = vadd.f32 %v739_v13, %v547_v9  ;;  %v796_v16 = vadd.f32 %v771_v14, %v555_v10 }
 0x136   : > { %804 = vst [vmem:[#allocation2 + $0x68] sm:$0xff] %v788_v15  ;;  %812 = vst [vmem:[#allocation2 + $0x70] sm:$0xff] %v796_v16 }
 0x137   : > { %v837_v17 = vld [vmem:[%s2227_s12 + $0x10] sm:$0xff]  ;;  %v835_v18 = vld [vmem:[%s2227_s12] sm:$0xff]  ;;  %v2080_v19 = vmov 0   ;;  %v838_v20 = vld [vmem:[%s2227_s12 + $0x18] sm:$0xff] }
 0x138   : > { %1998 = vset.pattern.permute.xlu1 %v2080_v19  ;;  %1997 = vset.pattern.permute.xlu0 %v2080_v19  ;;  %v836_v21 = vld [vmem:[%s2227_s12 + $0x8] sm:$0xff]  ;;  %v839_v23 = vld [vmem:[%s2227_s12 + $0x20] sm:$0xff]  ;;  %v1999_v24 = vld [vmem:[%s2423_s5 + $0x38] sm:$0xff]  }
 0x139   : > { %863 = vperm.xlu1 %1998, %v837_v17   ;;  %853 = vperm.xlu0 %1997, %v835_v18   ;;  %v840_v22 = vld [vmem:[%s2227_s12 + $0x28] sm:$0xff]  ;;  %v2000_v25 = vld [vmem:[%s2423_s5 + $0x30] sm:$0xff]   ;;  %v2001_v26 = vld [vmem:[%s2422_s4 + $0x38] sm:$0xff]  }
 0x13a   : > { %1843 = vmatprep.subr.bf16.mxu0 %v1999_v24  ;;  %v842_v27 = vld [vmem:[%s2227_s12 + $0x38] sm:$0xff]  ;;  %v841_v28 = vld [vmem:[%s2227_s12 + $0x30] sm:$0xff]  ;;  %1875 = vmatprep.subr.bf16.mxu1 %v2001_v26  ;;  %v2002_v30 = vld [vmem:[%s2423_s5 + $0x28] sm:$0xff]  }
 0x13b   : > { %1844 = vmatpush3.bf16.msra.mxu0 %v1999_v24  ;;  %v2003_v29 = vld [vmem:[%s2422_s4 + $0x30] sm:$0xff]   ;;  %1876 = vmatpush3.bf16.msra.mxu1 %v2001_v26  ;;  %v844_v31 = vld [vmem:[%s2227_s12 + $0x48] sm:$0xff]  ;;  %v843_v33 = vld [vmem:[%s2227_s12 + $0x40] sm:$0xff] }
 0x13c   : > { %1845 = vmatprep.subr.bf16.mxu0 %v2000_v25  ;;  %1877 = vmatprep.subr.bf16.mxu1 %v2003_v29  ;;  %v2005_v32 = vld [vmem:[%s2422_s4 + $0x28] sm:$0xff]   ;;  %v2004_v34 = vld [vmem:[%s2423_s5 + $0x20] sm:$0xff]   ;;  %v846_v36 = vld [vmem:[%s2227_s12 + $0x58] sm:$0xff] }
 0x13d   : > { %868 = vperm.xlu1 %1998, %v838_v20   ;;  %858 = vperm.xlu0 %1997, %v836_v21   ;;  %v2007_v35 = vld [vmem:[%s2422_s4 + $0x20] sm:$0xff]   ;;  %v845_v37 = vld [vmem:[%s2227_s12 + $0x50] sm:$0xff]  ;;  %v2006_v38 = vld [vmem:[%s2423_s5 + $0x18] sm:$0xff]  }
 0x13e   : > { %v2009_v39 = vld [vmem:[%s2422_s4 + $0x18] sm:$0xff]   ;;  %v2014_v40 = vld [vmem:[%s2222_s17] sm:$0xff]   ;;  %v848_v41 = vld [vmem:[%s2227_s12 + $0x68] sm:$0xff] }
 0x13f   : > { %1846 = vmatpush3.bf16.msra.mxu0 %v2000_v25  ;;  %1878 = vmatpush3.bf16.msra.mxu1 %v2003_v29  ;;  %v847_v42 = vld [vmem:[%s2227_s12 + $0x60] sm:$0xff]  ;;  %v2008_v43 = vld [vmem:[%s2423_s5 + $0x10] sm:$0xff]   ;;  %v850_v45 = vld [vmem:[%s2227_s12 + $0x78] sm:$0xff] }
 0x140   : > { %1847 = vmatprep.subr.bf16.mxu0 %v2002_v30  ;;  %1879 = vmatprep.subr.bf16.mxu1 %v2005_v32  ;;  %v2011_v44 = vld [vmem:[%s2422_s4 + $0x10] sm:$0xff]   ;;  %v2010_v47 = vld [vmem:[%s2423_s5 + $0x8] sm:$0xff]   ;;  %v2012_v49 = vld [vmem:[%s2423_s5] sm:$0xff]  }
 0x141   : > { %878 = vperm.xlu1 %1998, %v840_v22   ;;  %873 = vperm.xlu0 %1997, %v839_v23   ;;  %v849_v46 = vld [vmem:[%s2227_s12 + $0x70] sm:$0xff]  ;;  %v2013_v48 = vld [vmem:[%s2422_s4 + $0x8] sm:$0xff]   ;;  %v2016_v50 = vld [vmem:[%s2422_s4] sm:$0xff]  }
 0x142   : > { %1859 = vmatprep.mubr.bf16.mxu0 %v2014_v40  ;;  %v2015_v51 = vld [vmem:[%s2222_s17 + $0x8] sm:$0xff]   ;;  %v2017_v52 = vld [vmem:[%s2222_s17 + $0x10] sm:$0xff]   ;;  %v2018_v53 = vld [vmem:[%s2222_s17 + $0x18] sm:$0xff]  }
 0x143   : > { %1848 = vmatpush3.bf16.msra.mxu0 %v2002_v30  ;;  %1880 = vmatpush3.bf16.msra.mxu1 %v2005_v32  ;;  %v2019_v54 = vld [vmem:[%s2222_s17 + $0x20] sm:$0xff]   ;;  %v2020_v55 = vld [vmem:[%s2222_s17 + $0x28] sm:$0xff]   ;;  %v2021_v56 = vld [vmem:[%s2222_s17 + $0x30] sm:$0xff]  }
 0x144   : > { %1849 = vmatprep.subr.bf16.mxu0 %v2004_v34  ;;  %1881 = vmatprep.subr.bf16.mxu1 %v2007_v35  ;;  %v2022_v57 = vld [vmem:[%s2222_s17 + $0x38] sm:$0xff]   ;;  %v819_v61 = vld [vmem:[#allocation2 + $0x30] sm:$0xff]  ;;  %v820_v63 = vld [vmem:[#allocation2] sm:$0xff] }
 0x145   : > { %888 = vperm.xlu1 %1998, %v842_v27   ;;  %883 = vperm.xlu0 %1997, %v841_v28   ;;  %v821_v60 = vld [vmem:[#allocation2 + $0x58] sm:$0xff]  ;;  %v824_v6 = vld [vmem:[#allocation2 + $0x68] sm:$0xff]  ;;  %v823_v7 = vld [vmem:[#allocation2 + $0x50] sm:$0xff] }
 0x146   : > { %v822_v62 = vld [vmem:[#allocation2 + $0x18] sm:$0xff]  ;;  %v826_v14 = vld [vmem:[#allocation2 + $0x48] sm:$0xff]  ;;  %v828_v21 = vld [vmem:[#allocation2 + $0x20] sm:$0xff] }
 0x147   : > { %1850 = vmatpush3.bf16.msra.mxu0 %v2004_v34  ;;  %1882 = vmatpush3.bf16.msra.mxu1 %v2007_v35  ;;  %v825_v15 = vld [vmem:[#allocation2 + $0x8] sm:$0xff]  ;;  %v827_v22 = vld [vmem:[#allocation2 + $0x40] sm:$0xff]  ;;  %v830_v28 = vld [vmem:[#allocation2 + $0x38] sm:$0xff] }
 0x148   : > { %1851 = vmatprep.subr.bf16.mxu0 %v2006_v38  ;;  %1883 = vmatprep.subr.bf16.mxu1 %v2009_v39  ;;  %v829_v29 = vld [vmem:[#allocation2 + $0x10] sm:$0xff] }
 0x149   : > { %898 = vperm.xlu1 %1998, %v844_v31   ;;  %893 = vperm.xlu0 %1997, %v843_v33   ;;  %v832_v35 = vld [vmem:[#allocation2 + $0x70] sm:$0xff] }
 0x14b   : > { %1852 = vmatpush3.bf16.msra.mxu0 %v2006_v38  ;;  %1884 = vmatpush3.bf16.msra.mxu1 %v2009_v39 }
 0x14c   : > { %1853 = vmatprep.subr.bf16.mxu0 %v2008_v43  ;;  %1885 = vmatprep.subr.bf16.mxu1 %v2011_v44 }
 0x14d   : > { %908 = vperm.xlu1 %1998, %v846_v36   ;;  %903 = vperm.xlu0 %1997, %v845_v37   ;;  %v831_v36 = vld [vmem:[#allocation2 + $0x60] sm:$0xff] }
 0x14f   : > { %1854 = vmatpush3.bf16.msra.mxu0 %v2008_v43  ;;  %1886 = vmatpush3.bf16.msra.mxu1 %v2011_v44  ;;  %v833_v43 = vld [vmem:[#allocation2 + $0x78] sm:$0xff] }
 0x150   : > { %1855 = vmatprep.subr.bf16.mxu0 %v2010_v47  ;;  %1887 = vmatprep.subr.bf16.mxu1 %v2013_v48 }
 0x151   : > { %918 = vperm.xlu1 %1998, %v848_v41   ;;  %913 = vperm.xlu0 %1997, %v847_v42   ;;  %v834_v42 = vld [vmem:[#allocation2 + $0x28] sm:$0xff] }
 0x153   : > { %1856 = vmatpush3.bf16.msra.mxu0 %v2010_v47  ;;  %1888 = vmatpush3.bf16.msra.mxu1 %v2013_v48 }
 0x154   : > { %1857 = vmatprep.subr.bf16.mxu0 %v2012_v49  ;;  %1889 = vmatprep.subr.bf16.mxu1 %v2016_v50 }
 0x155   : > { %928 = vperm.xlu1 %1998, %v850_v45   ;;  %923 = vperm.xlu0 %1997, %v849_v46  }
 0x157   : > { %1858 = vmatpush3.bf16.msra.mxu0 %v2012_v49  ;;  %1890 = vmatpush3.bf16.msra.mxu1 %v2016_v50 }
 0x15a   : > { %1860 = vmatmul.mubr.bf16.vlgmr.msra.gmra.mxu0 %v2015_v51 }
 0x15b   : > { %1863 = vmatprep.mubr.bf16.mxu0 %v2017_v52 }
 0x162   : > { %1864 = vmatmul.mubr.bf16.gmra.mxu0 %v2018_v53 }
 0x163   : > { %1867 = vmatprep.mubr.bf16.mxu0 %v2019_v54 }
 0x16a   : > { %1868 = vmatmul.mubr.bf16.gmra.mxu0 %v2020_v55 }
 0x16b   : > { %1871 = vmatprep.mubr.bf16.mxu0 %v2021_v56 }
 0x172   : > { %1872 = vmatmul.mubr.bf16.gmra.mxu0 %v2022_v57 }
 0x1b4   : > { %v864_v58 = vpop.permute.xlu1 %863  ;;  %v854_v59 = vpop.permute.xlu0 %853 }
 0x1b5   : > { %v933_v2 = vmul.f32 %v864_v58, %v821_v60  ;;  %v931_v3 = vmul.f32 %v854_v59, %v819_v61  ;;  %v2329_v59 = vld [vmem:[%s2424_s6] ss:$0 sm:$0xff] }
 0x1b6   : > { %v2334_v61 = vld [vmem:[%s2425_s7] ss:$0 sm:$0xff] }
 0x1b8   : > { %v869_v0 = vpop.permute.xlu1 %868  ;;  %v859_v1 = vpop.permute.xlu0 %858 }
 0x1b9   : > { %v934_v4 = vmul.f32 %v869_v0, %v822_v62  ;;  %v932_v5 = vmul.f32 %v859_v1, %v820_v63 }
 0x1bb   : > { %v948_v8 = vpack.c.bf16 %v934_v4, %v933_v2  ;;  %v947_v9 = vpack.c.bf16 %v932_v5, %v931_v3  ;;  %v2341_v4 = vld [vmem:[%s2426_s8] ss:$0 sm:$0xff] }
 0x1bc   : > { %v879_v10 = vpop.permute.xlu1 %878  ;;  %v874_v11 = vpop.permute.xlu0 %873 }
 0x1bd   : > { %v936_v12 = vmul.f32 %v879_v10, %v824_v6  ;;  %v935_v13 = vmul.f32 %v874_v11, %v823_v7  ;;  %1891 = vmatprep.mubr.bf16.mxu1 %v947_v9 }
 0x1be   : > { %1892 = vmatmul.mubr.bf16.vlgmr.msra.gmra.mxu1 %v948_v8 }
 0x1bf   : > { %v949_v16 = vpack.c.bf16 %v936_v12, %v935_v13 }
 0x1c0   : > { %v889_v17 = vpop.permute.xlu1 %888  ;;  %v884_v18 = vpop.permute.xlu0 %883 }
 0x1c1   : > { %v938_v19 = vmul.f32 %v889_v17, %v826_v14  ;;  %v937_v20 = vmul.f32 %v884_v18, %v825_v15  ;;  %1895 = vmatprep.mubr.bf16.mxu1 %v949_v16 }
 0x1c3   : > { %v950_v23 = vpack.c.bf16 %v938_v19, %v937_v20 }
 0x1c4   : > { %v899_v24 = vpop.permute.xlu1 %898  ;;  %v894_v25 = vpop.permute.xlu0 %893 }
 0x1c5   : > { %v940_v26 = vmul.f32 %v899_v24, %v828_v21  ;;  %v939_v27 = vmul.f32 %v894_v25, %v827_v22 }
 0x1c6   : > { %1896 = vmatmul.mubr.bf16.gmra.mxu1 %v950_v23 }
 0x1c7   : > { %v951_v30 = vpack.c.bf16 %v940_v26, %v939_v27 }
 0x1c8   : > { %v909_v31 = vpop.permute.xlu1 %908  ;;  %v904_v32 = vpop.permute.xlu0 %903 }
 0x1c9   : > { %v942_v33 = vmul.f32 %v909_v31, %v830_v28  ;;  %v941_v34 = vmul.f32 %v904_v32, %v829_v29  ;;  %1899 = vmatprep.mubr.bf16.mxu1 %v951_v30 }
 0x1cb   : > { %v952_v37 = vpack.c.bf16 %v942_v33, %v941_v34 }
 0x1cc   : > { %v919_v38 = vpop.permute.xlu1 %918  ;;  %v914_v39 = vpop.permute.xlu0 %913 }
 0x1cd   : > { %v944_v40 = vmul.f32 %v919_v38, %v832_v35  ;;  %v943_v41 = vmul.f32 %v914_v39, %v831_v36 }
 0x1ce   : > { %1900 = vmatmul.mubr.bf16.gmra.mxu1 %v952_v37 }
 0x1cf   : > { %v953_v44 = vpack.c.bf16 %v944_v40, %v943_v41 }
 0x1d0   : > { %v929_v45 = vpop.permute.xlu1 %928  ;;  %v924_v46 = vpop.permute.xlu0 %923 }
 0x1d1   : > { %v946_v47 = vmul.f32 %v929_v45, %v834_v42  ;;  %v945_v48 = vmul.f32 %v924_v46, %v833_v43  ;;  %1903 = vmatprep.mubr.bf16.mxu1 %v953_v44 }
 0x1d3   : > { %v954_v49 = vpack.c.bf16 %v946_v47, %v945_v48 }
 0x1d6   : > { %1904 = vmatmul.mubr.bf16.gmra.mxu1 %v954_v49 }
 0x21a   : > { %v1861_v50 = vpop.f32.mrf.mxu0 }
 0x21c   : > { %v1133_v51 = vpop.f32.mrf.mxu0 }
 0x21e   : > { %v1862_v52 = vpop.f32.mrf.mxu0 }
 0x220   : > { %v1136_v53 = vpop.f32.mrf.mxu0 }
 0x222   : > { %v1865_v54 = vpop.f32.mrf.mxu0 }
 0x224   : > { %v1149_v55 = vpop.f32.mrf.mxu0 }
 0x226   : > { %v1866_v56 = vpop.f32.mrf.mxu0 }
 0x228   : > { %v1152_v57 = vpop.f32.mrf.mxu0 }
 0x22a   : > { %v1869_v1 = vpop.f32.mrf.mxu0 }
 0x22c   : > { %v1165_v11 = vpop.f32.mrf.mxu0 }
 0x22e   : > { %v1870_v22 = vpop.f32.mrf.mxu0 }
 0x230   : > { %v1168_v37 = vpop.f32.mrf.mxu0 }
 0x232   : > { %v1873_v49 = vpop.f32.mrf.mxu0 }
 0x27e   : > { %v1893_v58 = vpop.f32.mrf.mxu1 }
 0x27f   : > { %v1287_v60 = vadd.f32 %v1893_v58, %v1861_v50 }
 0x280   : > { %v1278_v62 = vpop.f32.mrf.mxu1 }
 0x281   : > { %v1350_v63 = vadd.f32 %v2329_v59, %v1287_v60  ;;  %v1279_v0 = vadd.f32 %v1278_v62, %v1133_v51 }
 0x282   : > { %v1894_v2 = vpop.f32.mrf.mxu1 }
 0x283   : > { %v1373_v3 = vmul.f32 %v2334_v61, %v1350_v63  ;;  %v1348_v5 = vadd.f32 %v2329_v59, %v1279_v0  ;;  %v1290_v6 = vadd.f32 %v1894_v2, %v1862_v52  ;;  %v1181_v0 = vpop.f32.mrf.mxu0 }
 0x284   : > { %v1281_v7 = vpop.f32.mrf.mxu1 }
 0x285   : > { %v1371_v8 = vmul.f32 %v2334_v61, %v1348_v5  ;;  %v1351_v9 = vadd.f32 %v2329_v59, %v1290_v6  ;;  %v1282_v10 = vadd.f32 %v1281_v7, %v1136_v53  ;;  %v1396_v12 = vadd.f32 %v2341_v4, %v1373_v3 }
 0x286   : > { %v1897_v13 = vpop.f32.mrf.mxu1 }
 0x287   : > { %v1374_v14 = vmul.f32 %v2334_v61, %v1351_v9  ;;  %v1349_v15 = vadd.f32 %v2329_v59, %v1282_v10  ;;  %v1394_v16 = vadd.f32 %v2341_v4, %v1371_v8  ;;  %v1303_v17 = vadd.f32 %v1897_v13, %v1865_v54 }
 0x288   : > { %v1294_v18 = vpop.f32.mrf.mxu1  ;;  %v1412_v23 = vmax.f32 %v1396_v12, 0.0 }
 0x289   : > { %v1397_v19 = vadd.f32 %v2341_v4, %v1374_v14  ;;  %v1372_v20 = vmul.f32 %v2334_v61, %v1349_v15  ;;  %v1295_v21 = vadd.f32 %v1294_v18, %v1149_v55  ;;  %v1354_v24 = vadd.f32 %v2329_v59, %v1303_v17  ;;  %v1874_v14 = vpop.f32.mrf.mxu0 }
 0x28a   : > { %v1898_v25 = vpop.f32.mrf.mxu1  ;;  %v1410_v30 = vmax.f32 %v1394_v16, 0.0 }
 0x28b   : > { %v1413_v26 = vmax.f32 %v1397_v19, 0.0  ;;  %v1395_v27 = vadd.f32 %v2341_v4, %v1372_v20  ;;  %v1352_v28 = vadd.f32 %v2329_v59, %v1295_v21  ;;  %v1306_v29 = vadd.f32 %v1898_v25, %v1866_v56 }
 0x28c   : > { %v1377_v31 = vmul.f32 %v2334_v61, %v1354_v24  ;;  %v1297_v32 = vpop.f32.mrf.mxu1 }
 0x28d   : > { %v1724_v33 = vpack.c.bf16 %v1413_v26, %v1412_v23  ;;  %v1411_v34 = vmax.f32 %v1395_v27, 0.0  ;;  %v1375_v35 = vmul.f32 %v2334_v61, %v1352_v28  ;;  %v1355_v36 = vadd.f32 %v2329_v59, %v1306_v29  ;;  %v1184_v28 = vpop.f32.mrf.mxu0 }
 0x28e   : > { %v1400_v38 = vadd.f32 %v2341_v4, %v1377_v31  ;;  %v1298_v39 = vadd.f32 %v1297_v32, %v1152_v57  ;;  %v1901_v40 = vpop.f32.mrf.mxu1 }
 0x28f   : > { %1756 = vst [vmem:[%s2232_s14 + $0x8] sm:$0xff] %v1724_v33   ;;  %v1719_v41 = vpack.c.bf16 %v1411_v34, %v1410_v30  ;;  %v1378_v42 = vmul.f32 %v2334_v61, %v1355_v36  ;;  %v1319_v43 = vadd.f32 %v1901_v40, %v1869_v1  ;;  %v1398_v46 = vadd.f32 %v2341_v4, %v1375_v35 }
 0x290   : > { %v1353_v44 = vadd.f32 %v2329_v59, %v1298_v39  ;;  %v1310_v45 = vpop.f32.mrf.mxu1  ;;  %v1416_v51 = vmax.f32 %v1400_v38, 0.0 }
 0x291   : > { %1720 = vst [vmem:[%s2232_s14] sm:$0xff] %v1719_v41   ;;  %v1401_v47 = vadd.f32 %v2341_v4, %v1378_v42  ;;  %v1358_v48 = vadd.f32 %v2329_v59, %v1319_v43  ;;  %v1311_v50 = vadd.f32 %v1310_v45, %v1165_v11  ;;  %v1414_v62 = vmax.f32 %v1398_v46, 0.0 }
 0x292   : > { %v1376_v52 = vmul.f32 %v2334_v61, %v1353_v44  ;;  %v1902_v53 = vpop.f32.mrf.mxu1 }
 0x293   : > { %v1417_v54 = vmax.f32 %v1401_v47, 0.0  ;;  %v1381_v55 = vmul.f32 %v2334_v61, %v1358_v48  ;;  %v1356_v56 = vadd.f32 %v2329_v59, %v1311_v50  ;;  %v1322_v57 = vadd.f32 %v1902_v53, %v1870_v22 }
 0x294   : > { %v1399_v58 = vadd.f32 %v2341_v4, %v1376_v52  ;;  %v1313_v60 = vpop.f32.mrf.mxu1 }
 0x295   : > { %v1734_v63 = vpack.c.bf16 %v1417_v54, %v1416_v51  ;;  %v1359_v1 = vadd.f32 %v2329_v59, %v1322_v57  ;;  %v1404_v3 = vadd.f32 %v2341_v4, %v1381_v55  ;;  %v1379_v5 = vmul.f32 %v2334_v61, %v1356_v56 }
 0x296   : > { %v1415_v2 = vmax.f32 %v1399_v58, 0.0  ;;  %v1314_v6 = vadd.f32 %v1313_v60, %v1168_v37  ;;  %v1905_v7 = vpop.f32.mrf.mxu1 }
 0x297   : > { %1758 = vst [vmem:[%s2232_s14 + $0x18] sm:$0xff] %v1734_v63   ;;  %v1382_v8 = vmul.f32 %v2334_v61, %v1359_v1  ;;  %v1335_v9 = vadd.f32 %v1905_v7, %v1873_v49  ;;  %v1420_v17 = vmax.f32 %v1404_v3, 0.0  ;;  %v1402_v18 = vadd.f32 %v2341_v4, %v1379_v5 }
 0x298   : > { %v1729_v10 = vpack.c.bf16 %v1415_v2, %v1414_v62  ;;  %v1357_v11 = vadd.f32 %v2329_v59, %v1314_v6  ;;  %v1326_v12 = vpop.f32.mrf.mxu1 }
 0x299   : > { %v1405_v13 = vadd.f32 %v2341_v4, %v1382_v8  ;;  %v1362_v15 = vadd.f32 %v2329_v59, %v1335_v9  ;;  %v1327_v16 = vadd.f32 %v1326_v12, %v1181_v0  ;;  %v1418_v30 = vmax.f32 %v1402_v18, 0.0 }
 0x29a   : > { %1757 = vst [vmem:[%s2232_s14 + $0x10] sm:$0xff] %v1729_v10   ;;  %v1380_v19 = vmul.f32 %v2334_v61, %v1357_v11  ;;  %v1906_v20 = vpop.f32.mrf.mxu1 }
 0x29b   : > { %v1421_v21 = vmax.f32 %v1405_v13, 0.0  ;;  %v1385_v22 = vmul.f32 %v2334_v61, %v1362_v15  ;;  %v1360_v23 = vadd.f32 %v2329_v59, %v1327_v16  ;;  %v1338_v24 = vadd.f32 %v1906_v20, %v1874_v14 }
 0x29c   : > { %v1403_v25 = vadd.f32 %v2341_v4, %v1380_v19  ;;  %v1329_v26 = vpop.f32.mrf.mxu1 }
 0x29d   : > { %v1744_v27 = vpack.c.bf16 %v1421_v21, %v1420_v17  ;;  %v1363_v29 = vadd.f32 %v2329_v59, %v1338_v24  ;;  %v1383_v32 = vmul.f32 %v2334_v61, %v1360_v23  ;;  %v1330_v33 = vadd.f32 %v1329_v26, %v1184_v28 }
 0x29e   : > { %v1419_v31 = vmax.f32 %v1403_v25, 0.0  ;;  %v1408_v34 = vadd.f32 %v2341_v4, %v1385_v22 }
 0x29f   : > { %1760 = vst [vmem:[%s2232_s14 + $0x28] sm:$0xff] %v1744_v27   ;;  %v1386_v35 = vmul.f32 %v2334_v61, %v1363_v29  ;;  %v1361_v37 = vadd.f32 %v2329_v59, %v1330_v33  ;;  %v1406_v39 = vadd.f32 %v2341_v4, %v1383_v32 }
 0x2a0   : > { %v1739_v36 = vpack.c.bf16 %v1419_v31, %v1418_v30  ;;  %v1424_v41 = vmax.f32 %v1408_v34, 0.0 }
 0x2a1   : > { %v1409_v38 = vadd.f32 %v2341_v4, %v1386_v35  ;;  %v1384_v40 = vmul.f32 %v2334_v61, %v1361_v37  ;;  %v1422_v45 = vmax.f32 %v1406_v39, 0.0 }
 0x2a2   : > { %1759 = vst [vmem:[%s2232_s14 + $0x20] sm:$0xff] %v1739_v36  }
 0x2a3   : > { %v1425_v42 = vmax.f32 %v1409_v38, 0.0  ;;  %v1407_v43 = vadd.f32 %v2341_v4, %v1384_v40 }
 0x2a5   : > { %v1754_v44 = vpack.c.bf16 %v1425_v42, %v1424_v41  ;;  %v1423_v46 = vmax.f32 %v1407_v43, 0.0 }
 0x2a7   : > { %1762 = vst [vmem:[%s2232_s14 + $0x38] sm:$0xff] %v1754_v44   ;;  %v1749_v47 = vpack.c.bf16 %v1423_v46, %v1422_v45 }
 0x2a9   : > { %1761 = vst [vmem:[%s2232_s14 + $0x30] sm:$0xff] %v1749_v47  }
 0x2aa PF: > { %s19_s15 = sadd.s32 1, %s2077_s15   ;;  %s2436_s12 = sld [smem:[#allocation4_spill]] }
 0x2ab   : > { %p16_p0 = scmp.ge.s32.totalorder %s19_s15, 6   ;;  %s2437_s27 = sld [smem:[#allocation5_spill]] }
 0x2ac   : > { %s2438_s14 = sld [smem:[#allocation6_spill]]  ;;  %s2439_s30 = smov %s2057_s10 }
 0x2ad   : > { %s2440_s10 = smov %s2182_s22  ;;  %s2441_s11 = smov %s2069_s13 }
 0x2ae   :  { %18 = sbr.rel (!%p16_p0) target bundleno = 6 (0x6), region = 149 }
 0x2b1   : > { %s2442_s13 = smov %s2437_s27 }

// kernel: sage_forward.5
= control target key start
LH: loop header
LB: loop body
LE: loop exit
PB: predicated region body
PF: predicated region fallthrough
CT: control target
= control target key end

     0   :  { %s2575_s0 = inlined_call_operand.vmem [shape: bf16[256,256], index: 0, kind: input, shape index: {}]   ;;  %s2576_s1 = inlined_call_operand.vmem [shape: bf16[256,128], index: 1, kind: input, shape index: {}, may-alias: {1,2}]   ;;  %s2577_s2 = inlined_call_operand.vmem [shape: bf16[256,128], index: 2, kind: input, shape index: {}, may-alias: {1,2}]   ;;  %s2578_s3 = inlined_call_operand.vmem [shape: f32[256,1], index: 3, kind: input, shape index: {}]   ;;  %s2579_s4 = inlined_call_operand.vmem [shape: bf16[128,128], index: 4, kind: input, shape index: {}]   ;;  %s2580_s5 = inlined_call_operand.vmem [shape: bf16[128,128], index: 5, kind: input, shape index: {}]   ;;  %s2581_s6 = inlined_call_operand.vmem [shape: f32[1,128], index: 6, kind: input, shape index: {}]   ;;  %s2582_s7 = inlined_call_operand.vmem [shape: f32[1,128], index: 7, kind: input, shape index: {}, may-alias: {7,8}]   ;;  %s2583_s8 = inlined_call_operand.vmem [shape: f32[1,128], index: 8, kind: input, shape index: {}, may-alias: {7,8}]   ;;  %s2584_s9 = inlined_call_operand.vmem [shape: f32[256,128], index: 9, kind: output, shape index: {}]  }
   0x1   :  { %2586 = sst [smem:[#allocation5_spill]] %s2575_s0 }
   0x2   :  { %s2167_s30 = smov 0   ;;  %s2169_s10 = smov 0  }
   0x3   :  { %s2171_s11 = smov 0   ;;  %s2173_s12 = smov 0  }
   0x4   :  { %s2175_s13 = smov 0   ;;  %s2177_s14 = smov 0  }
   0x5   :  { %s2179_s15 = smov 0  }
   0x6 LB: > { %s28_s7 = sadd.s32 1, %s2105_s13  ;;  %s31_s8 = sadd.s32 1, %s2109_s14  ;;  %s2113_s15 = sphi %s2179_s15, %s19_s15   ;;  %s2109_s14 = sphi %s2177_s14, %s2595_s14   ;;  %s2105_s13 = sphi %s2175_s13, %s2594_s13   ;;  %s2101_s12 = sphi %s2173_s12, %s2593_s12   ;;  %s2097_s11 = sphi %s2171_s11, %s2592_s11   ;;  %s2093_s10 = sphi %s2169_s10, %s2591_s10   ;;  %s2089_s30 = sphi %s2167_s30, %s2590_s30  }
   0x7   : > { %p29_p0 = scmp.ge.s32.totalorder %s28_s7, 2  ;;  %p47_p1 = scmp.ne.s32.totalorder %s2093_s10, %s2089_s30 }
   0x8   : > { %p48_p2 = scmp.eq.s32.totalorder %s2113_s15, 0  ;;  %s40_s19 = sadd.s32 1, %s2093_s10 }
   0x9   : > { %s2597_s7 = smov (%p29_p0, %s28_s7), 0  ;;  %s2599_s8 = smov (!%p29_p0, %s31_s8), %s2109_s14 }
   0xa   : > { %p49_p3 = por %p48_p2, %p47_p1  ;;  %p33_p4 = scmp.ge.s32.totalorder %s2599_s8, 2 }
   0xb   : > { %s36_s16 = ssub.s32 %s2105_s13, %s2597_s7  ;;  %p1674_p6 = scmp.ge.s32.totalorder %s2113_s15, 4 }
   0xc   : > { %s2601_s8 = smov (%p33_p4, %s2599_s8), 0 }
   0xd   : > { %2587 = sst [smem:[#allocation4_spill]] %s2601_s8  ;;  %s35_s17 = ssub.s32 %s2109_s14, %s2601_s8 }
   0xe   : > { %s37_s18 = sor.u32 %s36_s16, %s35_s17  ;;  %297 = sbr.rel (%p1674_p6) target bundleno = 39 (0x27), region = 36 }
   0xf   : > { %p38_p5 = scmp.eq.s32.totalorder %s37_s18, 0 }
  0x11   : > { %s2218_s20 = scalar_select %p38_p5, %s2093_s10, %s40_s19  }
  0x13   : > { %300 = sbr.rel (!%p49_p3) target bundleno = 39 (0x27), region = 40  ;;  %s302_s21 = sand.u32 (%p49_p3), 1, %s2093_s10  }
  0x14   : > { %s1734_s22 = sshll.u32 (%p49_p3), %s2109_s14, 5  ;;  %s1675_s23 = sshll.u32 (%p49_p3), %s302_s21, 6 }
  0x15   : > { %s307_s24 = sadd.s32 (%p49_p3), %s2105_s13, %s1734_s22  ;;  %s2588_s0 = sld [smem:[#allocation5_spill]] (%p49_p3) }
  0x16   : > { %s1678_s25 = sshll.u32 (%p49_p3), %s307_s24, 2  ;;  %s304_s29 = scalar_lea.vmem (%p49_p3), [#allocation3], %s1675_s23 }
  0x1b   : > { %s2227_s28 = scalar_lea.vmem %s2588_s0, %s1678_s25 }
  0x1c   : > { %v326_v0 = vld [vmem:[%s2227_s28] sm:$0xf]  ;;  %v328_v1 = vld [vmem:[%s2227_s28 + $0x8] sm:$0xf]  ;;  %v330_v2 = vld [vmem:[%s2227_s28 + $0x10] sm:$0xf] }
  0x1d   : > { %327 = vst [vmem:[%s304_s29] sm:$0xf] %v326_v0  ;;  %329 = vst [vmem:[%s304_s29 + $0x4] sm:$0xf] %v328_v1  ;;  %v332_v3 = vld [vmem:[%s2227_s28 + $0x18] sm:$0xf] }
  0x1e   : > { %331 = vst [vmem:[%s304_s29 + $0x8] sm:$0xf] %v330_v2  ;;  %v334_v4 = vld [vmem:[%s2227_s28 + $0x20] sm:$0xf]  ;;  %v336_v5 = vld [vmem:[%s2227_s28 + $0x28] sm:$0xf] }
  0x1f   : > { %333 = vst [vmem:[%s304_s29 + $0xc] sm:$0xf] %v332_v3  ;;  %335 = vst [vmem:[%s304_s29 + $0x10] sm:$0xf] %v334_v4  ;;  %v338_v6 = vld [vmem:[%s2227_s28 + $0x30] sm:$0xf] }
  0x20   : > { %337 = vst [vmem:[%s304_s29 + $0x14] sm:$0xf] %v336_v5  ;;  %v340_v7 = vld [vmem:[%s2227_s28 + $0x38] sm:$0xf]  ;;  %v342_v8 = vld [vmem:[%s2227_s28 + $0x40] sm:$0xf] }
  0x21   : > { %339 = vst [vmem:[%s304_s29 + $0x18] sm:$0xf] %v338_v6  ;;  %341 = vst [vmem:[%s304_s29 + $0x1c] sm:$0xf] %v340_v7  ;;  %v344_v9 = vld [vmem:[%s2227_s28 + $0x48] sm:$0xf] }
  0x22   : > { %343 = vst [vmem:[%s304_s29 + $0x20] sm:$0xf] %v342_v8  ;;  %v346_v10 = vld [vmem:[%s2227_s28 + $0x50] sm:$0xf]  ;;  %v348_v11 = vld [vmem:[%s2227_s28 + $0x58] sm:$0xf] }
  0x23   : > { %345 = vst [vmem:[%s304_s29 + $0x24] sm:$0xf] %v344_v9  ;;  %347 = vst [vmem:[%s304_s29 + $0x28] sm:$0xf] %v346_v10  ;;  %v350_v12 = vld [vmem:[%s2227_s28 + $0x60] sm:$0xf] }
  0x24   : > { %349 = vst [vmem:[%s304_s29 + $0x2c] sm:$0xf] %v348_v11  ;;  %v352_v13 = vld [vmem:[%s2227_s28 + $0x68] sm:$0xf]  ;;  %v354_v14 = vld [vmem:[%s2227_s28 + $0x70] sm:$0xf] }
  0x25   : > { %351 = vst [vmem:[%s304_s29 + $0x30] sm:$0xf] %v350_v12  ;;  %353 = vst [vmem:[%s304_s29 + $0x34] sm:$0xf] %v352_v13  ;;  %v356_v15 = vld [vmem:[%s2227_s28 + $0x78] sm:$0xf] }
  0x26   : > { %355 = vst [vmem:[%s304_s29 + $0x38] sm:$0xf] %v354_v14  ;;  %357 = vst [vmem:[%s304_s29 + $0x3c] sm:$0xf] %v356_v15 }
  0x27 PF: > { %p1679_p7 = scmp.ge.s32.totalorder %s2113_s15, 1  ;;  %p439_p8 = scmp.lt.s32.totalorder %s2113_s15, 5 }
  0x29   : > { %p440_p9 = pnand %p1679_p7, %p439_p8 }
  0x2a   : > { %s446_s16 = sand.u32 (!%p440_p9), 1, %s2089_s30   ;;  %s1681_s17 = sshll.u32 (!%p440_p9), %s2097_s11, 4 }
  0x2b   : > { %443 = sbr.rel (%p440_p9) target bundleno = 992 (0x3e0), region = 93  ;;  %s1680_s18 = sshll.u32 (!%p440_p9), %s446_s16, 6 }
  0x2c   : > { %p498_p10 = scmp.lt.s32.totalorder (!%p440_p9), %s1681_s17, 31  ;;  %s1683_s19 = sshll.u32 (!%p440_p9), %s2101_s12, 4 }
  0x2d   : > { %p504_p11 = scmp.lt.s32.totalorder (!%p440_p9), %s1683_s19, 31  ;;  %p1689_p12 = scmp.ne.s32.totalorder (!%p440_p9), %s2097_s11, 0 }
  0x30   : > { %s2603_s17 = smov (!%p498_p10, %s1681_s17), 31  ;;  %s2605_s19 = smov (!%p504_p11, %s1683_s19), 31 }
  0x31   : > { %s1682_s21 = sshll.u32 %s2603_s17, 2  ;;  %s1684_s25 = sshll.u32 %s2605_s19, 2 }
  0x32   : > { %s2253_s24 = scalar_lea.vmem %s2576_s1, %s1682_s21  ;;  %s1686_s26 = sshll.u32 %s2605_s19, 3 }
  0x33   : > { %s2258_s29 = scalar_lea.vmem %s2577_s2, %s1684_s25  ;;  %s2263_s12 = scalar_lea.vmem %s2578_s3, %s1686_s26 }
  0x34   : > { %s2268_s8 = scalar_lea.vmem %s2584_s9, %s1686_s26  ;;  %s2270_s21 = scalar_lea.vmem [#allocation3], %s1680_s18 }
  0x35   : > { %525 = sbr.rel (%p1689_p12) target bundleno = 67 (0x43), region = 101 }
  0x3a   : > { %v2115_v16 = vmov 0.0  }
  0x3b   : > { %526 = vst [vmem:[#allocation2 + $0x30] sm:$0xff] %v2115_v16  ;;  %527 = vst [vmem:[#allocation2] sm:$0xff] %v2115_v16 }
  0x3c   : > { %528 = vst [vmem:[#allocation2 + $0x58] sm:$0xff] %v2115_v16  ;;  %529 = vst [vmem:[#allocation2 + $0x18] sm:$0xff] %v2115_v16 }
  0x3d   : > { %530 = vst [vmem:[#allocation2 + $0x50] sm:$0xff] %v2115_v16  ;;  %531 = vst [vmem:[#allocation2 + $0x68] sm:$0xff] %v2115_v16 }
  0x3e   : > { %532 = vst [vmem:[#allocation2 + $0x8] sm:$0xff] %v2115_v16  ;;  %533 = vst [vmem:[#allocation2 + $0x48] sm:$0xff] %v2115_v16 }
  0x3f   : > { %534 = vst [vmem:[#allocation2 + $0x40] sm:$0xff] %v2115_v16  ;;  %535 = vst [vmem:[#allocation2 + $0x20] sm:$0xff] %v2115_v16 }
  0x40   : > { %536 = vst [vmem:[#allocation2 + $0x10] sm:$0xff] %v2115_v16  ;;  %537 = vst [vmem:[#allocation2 + $0x38] sm:$0xff] %v2115_v16 }
  0x41   : > { %538 = vst [vmem:[#allocation2 + $0x60] sm:$0xff] %v2115_v16  ;;  %539 = vst [vmem:[#allocation2 + $0x70] sm:$0xff] %v2115_v16 }
  0x42   : > { %540 = vst [vmem:[#allocation2 + $0x78] sm:$0xff] %v2115_v16  ;;  %541 = vst [vmem:[#allocation2 + $0x28] sm:$0xff] %v2115_v16 }
  0x43 PF: > { %v1953_v17 = vld [vmem:[%s2253_s24 + $0x38] sm:$0xff]   ;;  %v1954_v18 = vld [vmem:[%s2253_s24 + $0x30] sm:$0xff]   ;;  %v1955_v19 = vld [vmem:[%s2253_s24 + $0x28] sm:$0xff]   ;;  %p1706_p13 = scmp.ne.s32.totalorder %s2097_s11, 1 }
  0x44   : > { %1783 = vmatprep.subr.bf16.mxu0 %v1953_v17  ;;  %1879 = vmatprep.subr.bf16.mxu1 %v1953_v17  ;;  %v1956_v20 = vld [vmem:[%s2253_s24 + $0x20] sm:$0xff]   ;;  %v1957_v23 = vld [vmem:[%s2253_s24 + $0x18] sm:$0xff]   ;;  %v1958_v24 = vld [vmem:[%s2253_s24 + $0x10] sm:$0xff]  }
  0x45   : > { %1784 = vmatpush3.bf16.msra.mxu0 %v1953_v17  ;;  %1887 = vmatpush3.bf16.msra.mxu1 %v1953_v17  ;;  %v1961_v21 = vld [vmem:[%s2270_s21] sm:$0xff]   ;;  %v1959_v25 = vld [vmem:[%s2253_s24 + $0x8] sm:$0xff]   ;;  %v1965_v29 = vld [vmem:[%s2270_s21 + $0x10] sm:$0xff]  }
  0x46   : > { %1785 = vmatprep.subr.bf16.mxu0 %v1954_v18  ;;  %1880 = vmatprep.subr.bf16.mxu1 %v1954_v18  ;;  %v1962_v22 = vld [vmem:[%s2270_s21 + $0x20] sm:$0xff]   ;;  %v1963_v27 = vld [vmem:[%s2270_s21 + $0x8] sm:$0xff]   ;;  %v1966_v30 = vld [vmem:[%s2270_s21 + $0x30] sm:$0xff]  }
  0x47   : > { %1799 = vmatprep.mubr.bf16.mxu0 %v1961_v21  ;;  %1807 = vmatprep.mubr.bf16.mxu1 %v1962_v22  ;;  %v1960_v26 = vld [vmem:[%s2253_s24] sm:$0xff]   ;;  %v1964_v28 = vld [vmem:[%s2270_s21 + $0x28] sm:$0xff]   ;;  %v1967_v31 = vld [vmem:[%s2270_s21 + $0x18] sm:$0xff]  }
  0x48   : > { %v1968_v32 = vld [vmem:[%s2270_s21 + $0x38] sm:$0xff]   ;;  %v552_v34 = vld [vmem:[#allocation2 + $0x10] sm:$0xff]  ;;  %v550_v38 = vld [vmem:[#allocation2 + $0x40] sm:$0xff] }
  0x49   : > { %1786 = vmatpush3.bf16.msra.mxu0 %v1954_v18  ;;  %1888 = vmatpush3.bf16.msra.mxu1 %v1954_v18  ;;  %v544_v33 = vld [vmem:[#allocation2 + $0x58] sm:$0xff]  ;;  %v542_v37 = vld [vmem:[#allocation2 + $0x30] sm:$0xff]  ;;  %v543_v49 = vld [vmem:[#allocation2] sm:$0xff] }
  0x4a   : > { %1787 = vmatprep.subr.bf16.mxu0 %v1955_v19  ;;  %1881 = vmatprep.subr.bf16.mxu1 %v1955_v19  ;;  %v545_v43 = vld [vmem:[#allocation2 + $0x18] sm:$0xff]  ;;  %v551_v50 = vld [vmem:[#allocation2 + $0x20] sm:$0xff]  ;;  %v548_v55 = vld [vmem:[#allocation2 + $0x8] sm:$0xff] }
  0x4b   : > { %v553_v44 = vld [vmem:[#allocation2 + $0x38] sm:$0xff]  ;;  %v546_v61 = vld [vmem:[#allocation2 + $0x50] sm:$0xff]  ;;  %v554_v62 = vld [vmem:[#allocation2 + $0x60] sm:$0xff] }
  0x4c   : > { %v556_v56 = vld [vmem:[#allocation2 + $0x78] sm:$0xff]  ;;  %v549_v3 = vld [vmem:[#allocation2 + $0x48] sm:$0xff]  ;;  %v555_v10 = vld [vmem:[#allocation2 + $0x70] sm:$0xff] }
  0x4d   : > { %1788 = vmatpush3.bf16.msra.mxu0 %v1955_v19  ;;  %1889 = vmatpush3.bf16.msra.mxu1 %v1955_v19  ;;  %v557_v4 = vld [vmem:[#allocation2 + $0x28] sm:$0xff] }
  0x4e   : > { %1789 = vmatprep.subr.bf16.mxu0 %v1956_v20  ;;  %1882 = vmatprep.subr.bf16.mxu1 %v1956_v20  ;;  %v547_v9 = vld [vmem:[#allocation2 + $0x68] sm:$0xff] }
  0x51   : > { %1790 = vmatpush3.bf16.msra.mxu0 %v1956_v20  ;;  %1890 = vmatpush3.bf16.msra.mxu1 %v1956_v20 }
  0x52   : > { %1791 = vmatprep.subr.bf16.mxu0 %v1957_v23  ;;  %1883 = vmatprep.subr.bf16.mxu1 %v1957_v23 }
  0x55   : > { %1792 = vmatpush3.bf16.msra.mxu0 %v1957_v23  ;;  %1891 = vmatpush3.bf16.msra.mxu1 %v1957_v23 }
  0x56   : > { %1793 = vmatprep.subr.bf16.mxu0 %v1958_v24  ;;  %1884 = vmatprep.subr.bf16.mxu1 %v1958_v24 }
  0x59   : > { %1794 = vmatpush3.bf16.msra.mxu0 %v1958_v24  ;;  %1892 = vmatpush3.bf16.msra.mxu1 %v1958_v24 }
  0x5a   : > { %1795 = vmatprep.subr.bf16.mxu0 %v1959_v25  ;;  %1885 = vmatprep.subr.bf16.mxu1 %v1959_v25 }
  0x5d   : > { %1796 = vmatpush3.bf16.msra.mxu0 %v1959_v25  ;;  %1893 = vmatpush3.bf16.msra.mxu1 %v1959_v25 }
  0x5e   : > { %1797 = vmatprep.subr.bf16.mxu0 %v1960_v26  ;;  %1886 = vmatprep.subr.bf16.mxu1 %v1960_v26 }
  0x61   : > { %1798 = vmatpush3.bf16.msra.mxu0 %v1960_v26  ;;  %1894 = vmatpush3.bf16.msra.mxu1 %v1960_v26 }
  0x64   : > { %1800 = vmatmul.mubr.bf16.vlgmr.msra.gmra.mxu0 %v1963_v27  ;;  %1808 = vmatmul.mubr.bf16.vlgmr.msra.gmra.mxu1 %v1964_v28 }
  0x65   : > { %1803 = vmatprep.mubr.bf16.mxu0 %v1965_v29  ;;  %1811 = vmatprep.mubr.bf16.mxu1 %v1966_v30 }
  0x6c   : > { %1804 = vmatmul.mubr.bf16.gmra.mxu0 %v1967_v31  ;;  %1812 = vmatmul.mubr.bf16.gmra.mxu1 %v1968_v32 }
 0x124   : > { %v1801_v35 = vpop.f32.mrf.mxu0  ;;  %v1809_v36 = vpop.f32.mrf.mxu1 }
 0x125   : > { %v785_v39 = vadd.f32 %v1801_v35, %v544_v33  ;;  %v793_v40 = vadd.f32 %v1809_v36, %v552_v34 }
 0x126   : > { %v720_v41 = vpop.f32.mrf.mxu0  ;;  %v752_v42 = vpop.f32.mrf.mxu1 }
 0x127   : > { %801 = vst [vmem:[#allocation2 + $0x58] sm:$0xff] %v785_v39  ;;  %809 = vst [vmem:[#allocation2 + $0x10] sm:$0xff] %v793_v40  ;;  %v783_v45 = vadd.f32 %v720_v41, %v542_v37  ;;  %v791_v46 = vadd.f32 %v752_v42, %v550_v38 }
 0x128   : > { %v1802_v47 = vpop.f32.mrf.mxu0  ;;  %v1810_v48 = vpop.f32.mrf.mxu1 }
 0x129   : > { %799 = vst [vmem:[#allocation2 + $0x30] sm:$0xff] %v783_v45  ;;  %807 = vst [vmem:[#allocation2 + $0x40] sm:$0xff] %v791_v46  ;;  %v786_v51 = vadd.f32 %v1802_v47, %v545_v43  ;;  %v794_v52 = vadd.f32 %v1810_v48, %v553_v44 }
 0x12a   : > { %v723_v53 = vpop.f32.mrf.mxu0  ;;  %v755_v54 = vpop.f32.mrf.mxu1 }
 0x12b   : > { %802 = vst [vmem:[#allocation2 + $0x18] sm:$0xff] %v786_v51  ;;  %810 = vst [vmem:[#allocation2 + $0x38] sm:$0xff] %v794_v52  ;;  %v784_v57 = vadd.f32 %v723_v53, %v543_v49  ;;  %v792_v58 = vadd.f32 %v755_v54, %v551_v50 }
 0x12c   : > { %v1805_v59 = vpop.f32.mrf.mxu0  ;;  %v1813_v60 = vpop.f32.mrf.mxu1 }
 0x12d   : > { %800 = vst [vmem:[#allocation2] sm:$0xff] %v784_v57  ;;  %808 = vst [vmem:[#allocation2 + $0x20] sm:$0xff] %v792_v58  ;;  %v789_v63 = vadd.f32 %v1805_v59, %v548_v55  ;;  %v797_v0 = vadd.f32 %v1813_v60, %v556_v56 }
 0x12e   : > { %v736_v1 = vpop.f32.mrf.mxu0  ;;  %v768_v2 = vpop.f32.mrf.mxu1 }
 0x12f   : > { %805 = vst [vmem:[#allocation2 + $0x8] sm:$0xff] %v789_v63  ;;  %813 = vst [vmem:[#allocation2 + $0x78] sm:$0xff] %v797_v0  ;;  %v787_v5 = vadd.f32 %v736_v1, %v546_v61  ;;  %v795_v6 = vadd.f32 %v768_v2, %v554_v62 }
 0x130   : > { %v1806_v7 = vpop.f32.mrf.mxu0  ;;  %v1814_v8 = vpop.f32.mrf.mxu1 }
 0x131   : > { %803 = vst [vmem:[#allocation2 + $0x50] sm:$0xff] %v787_v5  ;;  %811 = vst [vmem:[#allocation2 + $0x60] sm:$0xff] %v795_v6  ;;  %v790_v11 = vadd.f32 %v1806_v7, %v549_v3  ;;  %v798_v12 = vadd.f32 %v1814_v8, %v557_v4  ;;  %818 = sbr.rel (%p1706_p13) target bundleno = 992 (0x3e0), region = 105 }
 0x132   : > { %v739_v13 = vpop.f32.mrf.mxu0  ;;  %v771_v14 = vpop.f32.mrf.mxu1 }
 0x133   : > { %806 = vst [vmem:[#allocation2 + $0x48] sm:$0xff] %v790_v11  ;;  %814 = vst [vmem:[#allocation2 + $0x28] sm:$0xff] %v798_v12  ;;  %v788_v15 = vadd.f32 %v739_v13, %v547_v9  ;;  %v796_v16 = vadd.f32 %v771_v14, %v555_v10 }
 0x135   : > { %804 = vst [vmem:[#allocation2 + $0x68] sm:$0xff] %v788_v15  ;;  %812 = vst [vmem:[#allocation2 + $0x70] sm:$0xff] %v796_v16 }
 0x136   : > { %v837_v17 = vld [vmem:[%s2263_s12 + $0x10] sm:$0xff]  ;;  %v835_v18 = vld [vmem:[%s2263_s12] sm:$0xff]  ;;  %v2116_v19 = vmov 0   ;;  %v838_v20 = vld [vmem:[%s2263_s12 + $0x18] sm:$0xff] }
 0x137   : > { %1970 = vset.pattern.permute.xlu1 %v2116_v19  ;;  %1969 = vset.pattern.permute.xlu0 %v2116_v19  ;;  %v836_v21 = vld [vmem:[%s2263_s12 + $0x8] sm:$0xff]  ;;  %v839_v23 = vld [vmem:[%s2263_s12 + $0x20] sm:$0xff]  ;;  %v1971_v24 = vld [vmem:[%s2580_s5 + $0x38] sm:$0xff]  }
 0x138   : > { %863 = vperm.xlu1 %1970, %v837_v17   ;;  %853 = vperm.xlu0 %1969, %v835_v18   ;;  %v840_v22 = vld [vmem:[%s2263_s12 + $0x28] sm:$0xff]  ;;  %v1972_v25 = vld [vmem:[%s2580_s5 + $0x30] sm:$0xff]   ;;  %v1973_v26 = vld [vmem:[%s2579_s4 + $0x38] sm:$0xff]  }
 0x139   : > { %1815 = vmatprep.subr.bf16.mxu0 %v1971_v24  ;;  %v842_v27 = vld [vmem:[%s2263_s12 + $0x38] sm:$0xff]  ;;  %v841_v28 = vld [vmem:[%s2263_s12 + $0x30] sm:$0xff]  ;;  %1847 = vmatprep.subr.bf16.mxu1 %v1973_v26  ;;  %v1974_v30 = vld [vmem:[%s2580_s5 + $0x28] sm:$0xff]  }
 0x13a   : > { %1816 = vmatpush3.bf16.msra.mxu0 %v1971_v24  ;;  %v1975_v29 = vld [vmem:[%s2579_s4 + $0x30] sm:$0xff]   ;;  %1848 = vmatpush3.bf16.msra.mxu1 %v1973_v26  ;;  %v844_v31 = vld [vmem:[%s2263_s12 + $0x48] sm:$0xff]  ;;  %v843_v33 = vld [vmem:[%s2263_s12 + $0x40] sm:$0xff] }
 0x13b   : > { %1817 = vmatprep.subr.bf16.mxu0 %v1972_v25  ;;  %1849 = vmatprep.subr.bf16.mxu1 %v1975_v29  ;;  %v1977_v32 = vld [vmem:[%s2579_s4 + $0x28] sm:$0xff]   ;;  %v1976_v34 = vld [vmem:[%s2580_s5 + $0x20] sm:$0xff]   ;;  %v846_v36 = vld [vmem:[%s2263_s12 + $0x58] sm:$0xff] }
 0x13c   : > { %868 = vperm.xlu1 %1970, %v838_v20   ;;  %858 = vperm.xlu0 %1969, %v836_v21   ;;  %v1979_v35 = vld [vmem:[%s2579_s4 + $0x20] sm:$0xff]   ;;  %v845_v37 = vld [vmem:[%s2263_s12 + $0x50] sm:$0xff]  ;;  %v1978_v38 = vld [vmem:[%s2580_s5 + $0x18] sm:$0xff]  }
 0x13d   : > { %v1981_v39 = vld [vmem:[%s2579_s4 + $0x18] sm:$0xff]   ;;  %v1986_v40 = vld [vmem:[%s2258_s29] sm:$0xff]   ;;  %v848_v41 = vld [vmem:[%s2263_s12 + $0x68] sm:$0xff] }
 0x13e   : > { %1818 = vmatpush3.bf16.msra.mxu0 %v1972_v25  ;;  %1850 = vmatpush3.bf16.msra.mxu1 %v1975_v29  ;;  %v847_v42 = vld [vmem:[%s2263_s12 + $0x60] sm:$0xff]  ;;  %v1980_v43 = vld [vmem:[%s2580_s5 + $0x10] sm:$0xff]   ;;  %v850_v44 = vld [vmem:[%s2263_s12 + $0x78] sm:$0xff] }
 0x13f   : > { %1819 = vmatprep.subr.bf16.mxu0 %v1974_v30  ;;  %1851 = vmatprep.subr.bf16.mxu1 %v1977_v32  ;;  %v1983_v45 = vld [vmem:[%s2579_s4 + $0x10] sm:$0xff]   ;;  %v1982_v47 = vld [vmem:[%s2580_s5 + $0x8] sm:$0xff]   ;;  %v1984_v49 = vld [vmem:[%s2580_s5] sm:$0xff]  }
 0x140   : > { %878 = vperm.xlu1 %1970, %v840_v22   ;;  %873 = vperm.xlu0 %1969, %v839_v23   ;;  %v849_v46 = vld [vmem:[%s2263_s12 + $0x70] sm:$0xff]  ;;  %v1985_v48 = vld [vmem:[%s2579_s4 + $0x8] sm:$0xff]   ;;  %v1988_v50 = vld [vmem:[%s2579_s4] sm:$0xff]  }
 0x141   : > { %1831 = vmatprep.mubr.bf16.mxu0 %v1986_v40  ;;  %v1987_v51 = vld [vmem:[%s2258_s29 + $0x8] sm:$0xff]   ;;  %v1989_v52 = vld [vmem:[%s2258_s29 + $0x10] sm:$0xff]   ;;  %v1990_v53 = vld [vmem:[%s2258_s29 + $0x18] sm:$0xff]  }
 0x142   : > { %1820 = vmatpush3.bf16.msra.mxu0 %v1974_v30  ;;  %1852 = vmatpush3.bf16.msra.mxu1 %v1977_v32  ;;  %v1991_v54 = vld [vmem:[%s2258_s29 + $0x20] sm:$0xff]   ;;  %v1992_v55 = vld [vmem:[%s2258_s29 + $0x28] sm:$0xff]   ;;  %v1993_v56 = vld [vmem:[%s2258_s29 + $0x30] sm:$0xff]  }
 0x143   : > { %1821 = vmatprep.subr.bf16.mxu0 %v1976_v34  ;;  %1853 = vmatprep.subr.bf16.mxu1 %v1979_v35  ;;  %v1994_v57 = vld [vmem:[%s2258_s29 + $0x38] sm:$0xff]   ;;  %v819_v61 = vld [vmem:[#allocation2 + $0x30] sm:$0xff]  ;;  %v820_v63 = vld [vmem:[#allocation2] sm:$0xff] }
 0x144   : > { %888 = vperm.xlu1 %1970, %v842_v27   ;;  %883 = vperm.xlu0 %1969, %v841_v28   ;;  %v821_v60 = vld [vmem:[#allocation2 + $0x58] sm:$0xff]  ;;  %v824_v6 = vld [vmem:[#allocation2 + $0x68] sm:$0xff]  ;;  %v823_v7 = vld [vmem:[#allocation2 + $0x50] sm:$0xff] }
 0x145   : > { %v822_v62 = vld [vmem:[#allocation2 + $0x18] sm:$0xff]  ;;  %v826_v14 = vld [vmem:[#allocation2 + $0x48] sm:$0xff]  ;;  %v828_v21 = vld [vmem:[#allocation2 + $0x20] sm:$0xff] }
 0x146   : > { %1822 = vmatpush3.bf16.msra.mxu0 %v1976_v34  ;;  %1854 = vmatpush3.bf16.msra.mxu1 %v1979_v35  ;;  %v825_v15 = vld [vmem:[#allocation2 + $0x8] sm:$0xff]  ;;  %v827_v22 = vld [vmem:[#allocation2 + $0x40] sm:$0xff]  ;;  %v830_v28 = vld [vmem:[#allocation2 + $0x38] sm:$0xff] }
 0x147   : > { %1823 = vmatprep.subr.bf16.mxu0 %v1978_v38  ;;  %1855 = vmatprep.subr.bf16.mxu1 %v1981_v39  ;;  %v829_v29 = vld [vmem:[#allocation2 + $0x10] sm:$0xff] }
 0x148   : > { %898 = vperm.xlu1 %1970, %v844_v31   ;;  %893 = vperm.xlu0 %1969, %v843_v33   ;;  %v832_v35 = vld [vmem:[#allocation2 + $0x70] sm:$0xff] }
 0x14a   : > { %1824 = vmatpush3.bf16.msra.mxu0 %v1978_v38  ;;  %1856 = vmatpush3.bf16.msra.mxu1 %v1981_v39 }
 0x14b   : > { %1825 = vmatprep.subr.bf16.mxu0 %v1980_v43  ;;  %1857 = vmatprep.subr.bf16.mxu1 %v1983_v45 }
 0x14c   : > { %908 = vperm.xlu1 %1970, %v846_v36   ;;  %903 = vperm.xlu0 %1969, %v845_v37   ;;  %v831_v36 = vld [vmem:[#allocation2 + $0x60] sm:$0xff] }
 0x14e   : > { %1826 = vmatpush3.bf16.msra.mxu0 %v1980_v43  ;;  %1858 = vmatpush3.bf16.msra.mxu1 %v1983_v45  ;;  %v833_v43 = vld [vmem:[#allocation2 + $0x78] sm:$0xff] }
 0x14f   : > { %1827 = vmatprep.subr.bf16.mxu0 %v1982_v47  ;;  %1859 = vmatprep.subr.bf16.mxu1 %v1985_v48 }
 0x150   : > { %918 = vperm.xlu1 %1970, %v848_v41   ;;  %913 = vperm.xlu0 %1969, %v847_v42   ;;  %v834_v42 = vld [vmem:[#allocation2 + $0x28] sm:$0xff] }
 0x152   : > { %1828 = vmatpush3.bf16.msra.mxu0 %v1982_v47  ;;  %1860 = vmatpush3.bf16.msra.mxu1 %v1985_v48 }
 0x153   : > { %1829 = vmatprep.subr.bf16.mxu0 %v1984_v49  ;;  %1861 = vmatprep.subr.bf16.mxu1 %v1988_v50 }
 0x154   : > { %928 = vperm.xlu1 %1970, %v850_v44   ;;  %923 = vperm.xlu0 %1969, %v849_v46  }
 0x156   : > { %1830 = vmatpush3.bf16.msra.mxu0 %v1984_v49  ;;  %1862 = vmatpush3.bf16.msra.mxu1 %v1988_v50 }
 0x159   : > { %1832 = vmatmul.mubr.bf16.vlgmr.msra.gmra.mxu0 %v1987_v51 }
 0x15a   : > { %1835 = vmatprep.mubr.bf16.mxu0 %v1989_v52 }
 0x161   : > { %1836 = vmatmul.mubr.bf16.gmra.mxu0 %v1990_v53 }
 0x162   : > { %1839 = vmatprep.mubr.bf16.mxu0 %v1991_v54 }
 0x169   : > { %1840 = vmatmul.mubr.bf16.gmra.mxu0 %v1992_v55 }
 0x16a   : > { %1843 = vmatprep.mubr.bf16.mxu0 %v1993_v56  ;;  %v1364_v56 = vlaneseq }
 0x171   : > { %1844 = vmatmul.mubr.bf16.gmra.mxu0 %v1994_v57 }
 0x1b3   : > { %v864_v58 = vpop.permute.xlu1 %863  ;;  %v854_v59 = vpop.permute.xlu0 %853 }
 0x1b4   : > { %v933_v2 = vmul.f32 %v864_v58, %v821_v60  ;;  %v931_v3 = vmul.f32 %v854_v59, %v819_v61  ;;  %v2362_v58 = vand.u32 127, %v1364_v56  ;;  %v2367_v61 = vld [vmem:[%s2581_s6] ss:$0 sm:$0xff] }
 0x1b6   : > { %vm1366_vm0 = vcmp.lt.s32.totalorder %v2362_v58, 8 }
 0x1b7   : > { %v869_v0 = vpop.permute.xlu1 %868  ;;  %v859_v1 = vpop.permute.xlu0 %858 }
 0x1b8   : > { %v934_v4 = vmul.f32 %v869_v0, %v822_v62  ;;  %v932_v5 = vmul.f32 %v859_v1, %v820_v63 }
 0x1ba   : > { %v948_v8 = vpack.c.bf16 %v934_v4, %v933_v2  ;;  %v947_v9 = vpack.c.bf16 %v932_v5, %v931_v3 }
 0x1bb   : > { %v879_v10 = vpop.permute.xlu1 %878  ;;  %v874_v11 = vpop.permute.xlu0 %873 }
 0x1bc   : > { %v936_v12 = vmul.f32 %v879_v10, %v824_v6  ;;  %v935_v13 = vmul.f32 %v874_v11, %v823_v7  ;;  %1863 = vmatprep.mubr.bf16.mxu1 %v947_v9 }
 0x1bd   : > { %1864 = vmatmul.mubr.bf16.vlgmr.msra.gmra.mxu1 %v948_v8 }
 0x1be   : > { %v949_v16 = vpack.c.bf16 %v936_v12, %v935_v13 }
 0x1bf   : > { %v889_v17 = vpop.permute.xlu1 %888  ;;  %v884_v18 = vpop.permute.xlu0 %883 }
 0x1c0   : > { %v938_v19 = vmul.f32 %v889_v17, %v826_v14  ;;  %v937_v20 = vmul.f32 %v884_v18, %v825_v15  ;;  %1867 = vmatprep.mubr.bf16.mxu1 %v949_v16 }
 0x1c2   : > { %v950_v23 = vpack.c.bf16 %v938_v19, %v937_v20 }
 0x1c3   : > { %v899_v24 = vpop.permute.xlu1 %898  ;;  %v894_v25 = vpop.permute.xlu0 %893 }
 0x1c4   : > { %v940_v26 = vmul.f32 %v899_v24, %v828_v21  ;;  %v939_v27 = vmul.f32 %v894_v25, %v827_v22 }
 0x1c5   : > { %1868 = vmatmul.mubr.bf16.gmra.mxu1 %v950_v23 }
 0x1c6   : > { %v951_v30 = vpack.c.bf16 %v940_v26, %v939_v27 }
 0x1c7   : > { %v909_v31 = vpop.permute.xlu1 %908  ;;  %v904_v32 = vpop.permute.xlu0 %903 }
 0x1c8   : > { %v942_v33 = vmul.f32 %v909_v31, %v830_v28  ;;  %v941_v34 = vmul.f32 %v904_v32, %v829_v29  ;;  %1871 = vmatprep.mubr.bf16.mxu1 %v951_v30 }
 0x1ca   : > { %v952_v37 = vpack.c.bf16 %v942_v33, %v941_v34 }
 0x1cb   : > { %v919_v38 = vpop.permute.xlu1 %918  ;;  %v914_v39 = vpop.permute.xlu0 %913 }
 0x1cc   : > { %v944_v40 = vmul.f32 %v919_v38, %v832_v35  ;;  %v943_v41 = vmul.f32 %v914_v39, %v831_v36 }
 0x1cd   : > { %1872 = vmatmul.mubr.bf16.gmra.mxu1 %v952_v37 }
 0x1ce   : > { %v953_v44 = vpack.c.bf16 %v944_v40, %v943_v41 }
 0x1cf   : > { %v929_v45 = vpop.permute.xlu1 %928  ;;  %v924_v46 = vpop.permute.xlu0 %923 }
 0x1d0   : > { %v946_v47 = vmul.f32 %v929_v45, %v834_v42  ;;  %v945_v48 = vmul.f32 %v924_v46, %v833_v43  ;;  %1875 = vmatprep.mubr.bf16.mxu1 %v953_v44 }
 0x1d2   : > { %v954_v49 = vpack.c.bf16 %v946_v47, %v945_v48 }
 0x1d5   : > { %1876 = vmatmul.mubr.bf16.gmra.mxu1 %v954_v49 }
 0x219   : > { %v1833_v50 = vpop.f32.mrf.mxu0 }
 0x21b   : > { %v1133_v51 = vpop.f32.mrf.mxu0 }
 0x21d   : > { %v1834_v52 = vpop.f32.mrf.mxu0 }
 0x21f   : > { %v1136_v53 = vpop.f32.mrf.mxu0 }
 0x221   : > { %v1837_v54 = vpop.f32.mrf.mxu0 }
 0x223   : > { %v1149_v55 = vpop.f32.mrf.mxu0 }
 0x225   : > { %v1838_v57 = vpop.f32.mrf.mxu0 }
 0x227   : > { %v1152_v59 = vpop.f32.mrf.mxu0 }
 0x229   : > { %v1841_v0 = vpop.f32.mrf.mxu0 }
 0x22b   : > { %v1165_v8 = vpop.f32.mrf.mxu0 }
 0x22d   : > { %v1842_v16 = vpop.f32.mrf.mxu0 }
 0x22f   : > { %v1168_v24 = vpop.f32.mrf.mxu0 }
 0x231   : > { %v1845_v34 = vpop.f32.mrf.mxu0 }
 0x233   : > { %v1181_v41 = vpop.f32.mrf.mxu0 }
 0x27d   : > { %v1865_v60 = vpop.f32.mrf.mxu1 }
 0x27e   : > { %v1287_v62 = vadd.f32 %v1865_v60, %v1833_v50  ;;  %v1846_v50 = vpop.f32.mrf.mxu0 }
 0x27f   : > { %v1278_v63 = vpop.f32.mrf.mxu1 }
 0x280   : > { %v1279_v1 = vadd.f32 %v1278_v63, %v1133_v51  ;;  %v1350_v2 = vadd.f32 %v2367_v61, %v1287_v62 }
 0x281   : > { %v1866_v3 = vpop.f32.mrf.mxu1 }
 0x282   : > { %v1290_v4 = vadd.f32 %v1866_v3, %v1834_v52  ;;  %v2373_v5 = vsel %vm1366_vm0, %v1350_v2, -1e+30  ;;  %v1348_v6 = vadd.f32 %v2367_v61, %v1279_v1 }
 0x283   : > { %1387 = vmax.xlane.f32.xlu0 %v2373_v5  ;;  %v1281_v7 = vpop.f32.mrf.mxu1 }
 0x284   : > { %v1282_v9 = vadd.f32 %v1281_v7, %v1136_v53  ;;  %v2379_v12 = vsel %vm1366_vm0, %v1348_v6, -1e+30  ;;  %v1351_v14 = vadd.f32 %v2367_v61, %v1290_v4 }
 0x285   : > { %v1869_v10 = vpop.f32.mrf.mxu1 }
 0x286   : > { %v1303_v11 = vadd.f32 %v1869_v10, %v1837_v54  ;;  %v1349_v13 = vadd.f32 %v2367_v61, %v1282_v9  ;;  %v2392_v22 = vsel %vm1366_vm0, %v1351_v14, -1e+30 }
 0x287   : > { %v1294_v15 = vpop.f32.mrf.mxu1  ;;  %1383 = vmax.xlane.f32.xlu0 %v2379_v12 }
 0x288   : > { %v1295_v17 = vadd.f32 %v1294_v15, %v1149_v55  ;;  %v2386_v18 = vsel %vm1366_vm0, %v1349_v13, -1e+30  ;;  %v1354_v19 = vadd.f32 %v2367_v61, %v1303_v11 }
 0x289   : > { %v1870_v20 = vpop.f32.mrf.mxu1  ;;  %1385 = vmax.xlane.f32.xlu1 %v2386_v18 }
 0x28a   : > { %v1306_v21 = vadd.f32 %v1870_v20, %v1838_v57  ;;  %v2397_v26 = vsel %vm1366_vm0, %v1354_v19, -1e+30  ;;  %v1352_v28 = vadd.f32 %v2367_v61, %v1295_v17 }
 0x28b   : > { %v1297_v23 = vpop.f32.mrf.mxu1  ;;  %1389 = vmax.xlane.f32.xlu0 %v2392_v22 }
 0x28c   : > { %v1298_v25 = vadd.f32 %v1297_v23, %v1152_v59  ;;  %v1355_v27 = vadd.f32 %v2367_v61, %v1306_v21  ;;  %v2410_v36 = vsel %vm1366_vm0, %v1352_v28, -1e+30  ;;  %v1184_v59 = vpop.f32.mrf.mxu0 }
 0x28d   : > { %v1873_v29 = vpop.f32.mrf.mxu1  ;;  %1395 = vmax.xlane.f32.xlu1 %v2397_v26 }
 0x28e   : > { %v1319_v30 = vadd.f32 %v1873_v29, %v1841_v0  ;;  %v2404_v31 = vsel %vm1366_vm0, %v1355_v27, -1e+30  ;;  %v1353_v32 = vadd.f32 %v2367_v61, %v1298_v25 }
 0x28f   : > { %v1310_v33 = vpop.f32.mrf.mxu1  ;;  %1397 = vmax.xlane.f32.xlu0 %v2404_v31 }
 0x290   : > { %v1311_v35 = vadd.f32 %v1310_v33, %v1165_v8  ;;  %v1358_v37 = vadd.f32 %v2367_v61, %v1319_v30  ;;  %v2416_v40 = vsel %vm1366_vm0, %v1353_v32, -1e+30 }
 0x291   : > { %v1874_v38 = vpop.f32.mrf.mxu1  ;;  %1391 = vmax.xlane.f32.xlu1 %v2410_v36 }
 0x292   : > { %v1322_v39 = vadd.f32 %v1874_v38, %v1842_v16  ;;  %v2421_v44 = vsel %vm1366_vm0, %v1358_v37, -1e+30  ;;  %v1356_v46 = vadd.f32 %v2367_v61, %v1311_v35 }
 0x293   : > { %v1313_v42 = vpop.f32.mrf.mxu1  ;;  %1393 = vmax.xlane.f32.xlu0 %v2416_v40 }
 0x294   : > { %v1314_v43 = vadd.f32 %v1313_v42, %v1168_v24  ;;  %v1359_v45 = vadd.f32 %v2367_v61, %v1322_v39  ;;  %v1375_v54 = vsel %vm1366_vm0, %v1356_v46, -1e+30 }
 0x295   : > { %v1877_v47 = vpop.f32.mrf.mxu1  ;;  %1403 = vmax.xlane.f32.xlu1 %v2421_v44 }
 0x296   : > { %v2428_v48 = vsel %vm1366_vm0, %v1359_v45, -1e+30  ;;  %v1357_v49 = vadd.f32 %v2367_v61, %v1314_v43  ;;  %v1335_v52 = vadd.f32 %v1877_v47, %v1845_v34 }
 0x297   : > { %v1326_v51 = vpop.f32.mrf.mxu1  ;;  %1405 = vmax.xlane.f32.xlu0 %v2428_v48 }
 0x298   : > { %v1327_v53 = vadd.f32 %v1326_v51, %v1181_v41  ;;  %v2436_v56 = vsel %vm1366_vm0, %v1357_v49, -1e+30  ;;  %v1362_v1 = vadd.f32 %v2367_v61, %v1335_v52 }
 0x299   : > { %v1878_v55 = vpop.f32.mrf.mxu1  ;;  %1399 = vmax.xlane.f32.xlu1 %v1375_v54 }
 0x29a   : > { %v1360_v57 = vadd.f32 %v2367_v61, %v1327_v53  ;;  %v1338_v62 = vadd.f32 %v1878_v55, %v1846_v50  ;;  %v2446_v3 = vsel %vm1366_vm0, %v1362_v1, -1e+30 }
 0x29b   : > { %v1329_v60 = vpop.f32.mrf.mxu1  ;;  %1401 = vmax.xlane.f32.xlu0 %v2436_v56 }
 0x29c   : > { %v1330_v63 = vadd.f32 %v1329_v60, %v1184_v59  ;;  %v1379_v0 = vsel %vm1366_vm0, %v1360_v57, -1e+30  ;;  %v1363_v6 = vadd.f32 %v2367_v61, %v1338_v62 }
 0x29d   : > { %1407 = vmax.xlane.f32.xlu1 %v1379_v0 }
 0x29e   : > { %v1361_v2 = vadd.f32 %v2367_v61, %v1330_v63  ;;  %v2457_v7 = vsel %vm1366_vm0, %v1363_v6, -1e+30 }
 0x2a0   : > { %v2450_v4 = vsel %vm1366_vm0, %v1361_v2, -1e+30 }
 0x2a1   : > { %1411 = vmax.xlane.f32.xlu1 %v2446_v3  ;;  %1409 = vmax.xlane.f32.xlu0 %v2450_v4 }
 0x2a5   : > { %1413 = vmax.xlane.f32.xlu0 %v2457_v7 }
 0x30c   : > { %v1388_v8 = vpop.xlane.xlu0 %1387 }
 0x30d   : > { %v2461_v9 = vsub.f32 %v2373_v5, %v1388_v8 }
 0x30f   : > { %v1435_v10 = vmul.f32 1.442695, %v2461_v9 }
 0x310   : > { %v1384_v11 = vpop.xlane.xlu0 %1383 }
 0x311   : > { %1995 = vpow2.f32 %v1435_v10  ;;  %v2465_v61 = vsub.f32 %v2379_v12, %v1384_v11 }
 0x312   : > { %v1386_v13 = vpop.xlane.xlu1 %1385 }
 0x313   : > { %v1431_v14 = vmul.f32 1.442695, %v2465_v61  ;;  %v2469_v58 = vsub.f32 %v2386_v18, %v1386_v13 }
 0x314   : > { %v1390_v15 = vpop.xlane.xlu0 %1389 }
 0x315   : > { %1997 = vpow2.f32 %v1431_v14  ;;  %v2472_v16 = vsub.f32 %v2392_v22, %v1390_v15  ;;  %v1433_v12 = vmul.f32 1.442695, %v2469_v58 }
 0x316   : > { %v1396_v5 = vpop.xlane.xlu1 %1395 }
 0x317   : > { %v1437_v17 = vmul.f32 1.442695, %v2472_v16  ;;  %v2476_v19 = vsub.f32 %v2397_v26, %v1396_v5 }
 0x318   : > { %v1398_v20 = vpop.xlane.xlu0 %1397 }
 0x319   : > { %1999 = vpow2.f32 %v1437_v17  ;;  %v1443_v21 = vmul.f32 1.442695, %v2476_v19  ;;  %v2481_v23 = vsub.f32 %v2404_v31, %v1398_v20 }
 0x31a   : > { %v1392_v18 = vpop.xlane.xlu1 %1391 }
 0x31b   : > { %2001 = vpow2.f32 %v1443_v21  ;;  %v2484_v22 = vsub.f32 %v2410_v36, %v1392_v18  ;;  %v1445_v25 = vmul.f32 1.442695, %v2481_v23 }
 0x31c   : > { %v1394_v24 = vpop.xlane.xlu0 %1393  ;;  %2003 = vpow2.f32 %v1433_v12 }
 0x31d   : > { %v1439_v26 = vmul.f32 1.442695, %v2484_v22  ;;  %v2489_v27 = vsub.f32 %v2416_v40, %v1394_v24 }
 0x31e   : > { %v1996_v28 = vpop.eup %1995  ;;  %v1404_v29 = vpop.xlane.xlu1 %1403 }
 0x31f   : > { %2005 = vpow2.f32 %v1439_v26  ;;  %v2492_v30 = vsub.f32 %v2421_v44, %v1404_v29  ;;  %1467 = vadd.xlane.f32.xlu1 %v1996_v28  ;;  %v1441_v32 = vmul.f32 1.442695, %v2489_v27 }
 0x320   : > { %v1406_v31 = vpop.xlane.xlu0 %1405  ;;  %2007 = vpow2.f32 %v1445_v25 }
 0x321   : > { %v1451_v33 = vmul.f32 1.442695, %v2492_v30  ;;  %v2497_v34 = vsub.f32 %v2428_v48, %v1406_v31 }
 0x322   : > { %v1998_v35 = vpop.eup %1997  ;;  %v1400_v36 = vpop.xlane.xlu1 %1399 }
 0x323   : > { %2009 = vpow2.f32 %v1451_v33  ;;  %v2499_v37 = vsub.f32 %v1375_v54, %v1400_v36  ;;  %1463 = vadd.xlane.f32.xlu1 %v1998_v35  ;;  %v1453_v39 = vmul.f32 1.442695, %v2497_v34 }
 0x324   : > { %v1402_v38 = vpop.xlane.xlu0 %1401  ;;  %2011 = vpow2.f32 %v1441_v32 }
 0x325   : > { %v1447_v40 = vmul.f32 1.442695, %v2499_v37  ;;  %v2504_v41 = vsub.f32 %v2436_v56, %v1402_v38 }
 0x326   : > { %v2000_v42 = vpop.eup %1999  ;;  %v1408_v43 = vpop.xlane.xlu1 %1407 }
 0x327   : > { %2013 = vpow2.f32 %v1447_v40  ;;  %v2506_v44 = vsub.f32 %v1379_v0, %v1408_v43  ;;  %1469 = vadd.xlane.f32.xlu0 %v2000_v42  ;;  %v1449_v46 = vmul.f32 1.442695, %v2504_v41 }
 0x328   : > { %v2002_v45 = vpop.eup %2001  ;;  %2015 = vpow2.f32 %v1453_v39 }
 0x329   : > { %v1455_v47 = vmul.f32 1.442695, %v2506_v44  ;;  %1475 = vadd.xlane.f32.xlu1 %v2002_v45  ;;  %v2004_v48 = vpop.eup %2003 }
 0x32a   : > { %v1412_v49 = vpop.xlane.xlu1 %1411  ;;  %v1410_v50 = vpop.xlane.xlu0 %1409 }
 0x32b   : > { %2017 = vpow2.f32 %v1455_v47  ;;  %v2511_v51 = vsub.f32 %v2446_v3, %v1412_v49  ;;  %v2514_v52 = vsub.f32 %v2450_v4, %v1410_v50  ;;  %1465 = vadd.xlane.f32.xlu0 %v2004_v48 }
 0x32c   : > { %v2006_v53 = vpop.eup %2005  ;;  %2019 = vpow2.f32 %v1449_v46 }
 0x32d   : > { %v1459_v54 = vmul.f32 1.442695, %v2511_v51  ;;  %v1457_v55 = vmul.f32 1.442695, %v2514_v52  ;;  %1471 = vadd.xlane.f32.xlu1 %v2006_v53  ;;  %v2008_v56 = vpop.eup %2007 }
 0x32e   : > { %v1414_v57 = vpop.xlane.xlu0 %1413 }
 0x32f   : > { %2021 = vpow2.f32 %v1459_v54  ;;  %v2519_v59 = vsub.f32 %v2457_v7, %v1414_v57  ;;  %1477 = vadd.xlane.f32.xlu0 %v2008_v56 }
 0x330   : > { %v2010_v60 = vpop.eup %2009  ;;  %2023 = vpow2.f32 %v1457_v55 }
 0x331   : > { %v1461_v62 = vmul.f32 1.442695, %v2519_v59  ;;  %1483 = vadd.xlane.f32.xlu1 %v2010_v60  ;;  %v2012_v63 = vpop.eup %2011 }
 0x333   : > { %1473 = vadd.xlane.f32.xlu0 %v2012_v63  ;;  %2025 = vpow2.f32 %v1461_v62 }
 0x334   : > { %v2014_v0 = vpop.eup %2013 }
 0x335   : > { %1479 = vadd.xlane.f32.xlu1 %v2014_v0  ;;  %v2016_v1 = vpop.eup %2015 }
 0x337   : > { %1485 = vadd.xlane.f32.xlu0 %v2016_v1 }
 0x338   : > { %v2018_v2 = vpop.eup %2017 }
 0x339   : > { %1487 = vadd.xlane.f32.xlu1 %v2018_v2  ;;  %v2020_v3 = vpop.eup %2019 }
 0x33b   : > { %1481 = vadd.xlane.f32.xlu0 %v2020_v3 }
 0x33c   : > { %v2022_v4 = vpop.eup %2021 }
 0x33d   : > { %1491 = vadd.xlane.f32.xlu1 %v2022_v4  ;;  %v2024_v6 = vpop.eup %2023 }
 0x33f   : > { %1489 = vadd.xlane.f32.xlu0 %v2024_v6 }
 0x340   : > { %v2026_v7 = vpop.eup %2025 }
 0x343   : > { %1493 = vadd.xlane.f32.xlu0 %v2026_v7 }
 0x3a8   : > { %v1468_v8 = vpop.xlane.xlu1 %1467 }
 0x3a9   : > { %2027 = vlog2.f32 %v1468_v8 }
 0x3ac   : > { %v1464_v10 = vpop.xlane.xlu1 %1463 }
 0x3ad   : > { %2029 = vlog2.f32 %v1464_v10 }
 0x3b0   : > { %v1470_v11 = vpop.xlane.xlu0 %1469 }
 0x3b1   : > { %2031 = vlog2.f32 %v1470_v11 }
 0x3b2   : > { %v1476_v13 = vpop.xlane.xlu1 %1475 }
 0x3b3   : > { %2033 = vlog2.f32 %v1476_v13 }
 0x3b4   : > { %v1466_v14 = vpop.xlane.xlu0 %1465 }
 0x3b5   : > { %2035 = vlog2.f32 %v1466_v14 }
 0x3b6   : > { %v2028_v15 = vpop.eup %2027  ;;  %v1472_v5 = vpop.xlane.xlu1 %1471 }
 0x3b7   : > { %v1500_v17 = vmul.f32 0.6931472, %v2028_v15  ;;  %2037 = vlog2.f32 %v1472_v5 }
 0x3b8   : > { %v1478_v20 = vpop.xlane.xlu0 %1477 }
 0x3b9   : > { %v1529_v12 = vsub.f32 %v2461_v9, %v1500_v17  ;;  %2039 = vlog2.f32 %v1478_v20 }
 0x3ba   : > { %v2030_v21 = vpop.eup %2029  ;;  %v1484_v18 = vpop.xlane.xlu1 %1483 }
 0x3bb   : > { %1545 = vst [vmem:[%s2268_s8 + $0x10] sm:$0xff] %v1529_v12  ;;  %v1496_v24 = vmul.f32 0.6931472, %v2030_v21  ;;  %2041 = vlog2.f32 %v1484_v18 }
 0x3bc   : > { %v1474_v25 = vpop.xlane.xlu0 %1473 }
 0x3bd   : > { %v1527_v26 = vsub.f32 %v2465_v61, %v1496_v24  ;;  %2043 = vlog2.f32 %v1474_v25 }
 0x3be   : > { %v2032_v28 = vpop.eup %2031  ;;  %v1480_v29 = vpop.xlane.xlu1 %1479 }
 0x3bf   : > { %1543 = vst [vmem:[%s2268_s8] sm:$0xff] %v1527_v26  ;;  %v1502_v31 = vmul.f32 0.6931472, %v2032_v28  ;;  %2045 = vlog2.f32 %v1480_v29 }
 0x3c0   : > { %v2034_v32 = vpop.eup %2033  ;;  %v1486_v33 = vpop.xlane.xlu0 %1485 }
 0x3c1   : > { %v1530_v9 = vsub.f32 %v2472_v16, %v1502_v31  ;;  %v1508_v35 = vmul.f32 0.6931472, %v2034_v32  ;;  %2047 = vlog2.f32 %v1486_v33 }
 0x3c2   : > { %v2036_v36 = vpop.eup %2035  ;;  %v1488_v38 = vpop.xlane.xlu1 %1487 }
 0x3c3   : > { %1546 = vst [vmem:[%s2268_s8 + $0x18] sm:$0xff] %v1530_v9  ;;  %v1533_v39 = vsub.f32 %v2476_v19, %v1508_v35  ;;  %v1498_v61 = vmul.f32 0.6931472, %v2036_v36  ;;  %2049 = vlog2.f32 %v1488_v38 }
 0x3c4   : > { %v2038_v40 = vpop.eup %2037  ;;  %v1482_v42 = vpop.xlane.xlu0 %1481 }
 0x3c5   : > { %1549 = vst [vmem:[%s2268_s8 + $0x30] sm:$0xff] %v1533_v39  ;;  %v1528_v43 = vsub.f32 %v2469_v58, %v1498_v61  ;;  %v1504_v45 = vmul.f32 0.6931472, %v2038_v40  ;;  %2051 = vlog2.f32 %v1482_v42 }
 0x3c6   : > { %v2040_v16 = vpop.eup %2039  ;;  %v1492_v46 = vpop.xlane.xlu1 %1491 }
 0x3c7   : > { %1544 = vst [vmem:[%s2268_s8 + $0x8] sm:$0xff] %v1528_v43  ;;  %v1531_v47 = vsub.f32 %v2484_v22, %v1504_v45  ;;  %v1510_v48 = vmul.f32 0.6931472, %v2040_v16  ;;  %2053 = vlog2.f32 %v1492_v46 }
 0x3c8   : > { %v2042_v19 = vpop.eup %2041  ;;  %v1490_v49 = vpop.xlane.xlu0 %1489 }
 0x3c9   : > { %1547 = vst [vmem:[%s2268_s8 + $0x20] sm:$0xff] %v1531_v47  ;;  %v1534_v50 = vsub.f32 %v2481_v23, %v1510_v48  ;;  %v1516_v53 = vmul.f32 0.6931472, %v2042_v19  ;;  %2055 = vlog2.f32 %v1490_v49 }
 0x3ca   : > { %v2044_v58 = vpop.eup %2043 }
 0x3cb   : > { %1550 = vst [vmem:[%s2268_s8 + $0x38] sm:$0xff] %v1534_v50  ;;  %v1537_v54 = vsub.f32 %v2492_v30, %v1516_v53  ;;  %v1506_v55 = vmul.f32 0.6931472, %v2044_v58 }
 0x3cc   : > { %v2046_v56 = vpop.eup %2045  ;;  %v1494_v57 = vpop.xlane.xlu0 %1493 }
 0x3cd   : > { %1553 = vst [vmem:[%s2268_s8 + $0x50] sm:$0xff] %v1537_v54  ;;  %v1532_v22 = vsub.f32 %v2489_v27, %v1506_v55  ;;  %v1512_v60 = vmul.f32 0.6931472, %v2046_v56  ;;  %2057 = vlog2.f32 %v1494_v57 }
 0x3ce   : > { %v2048_v62 = vpop.eup %2047 }
 0x3cf   : > { %1548 = vst [vmem:[%s2268_s8 + $0x28] sm:$0xff] %v1532_v22  ;;  %v1535_v23 = vsub.f32 %v2499_v37, %v1512_v60  ;;  %v1518_v63 = vmul.f32 0.6931472, %v2048_v62 }
 0x3d0   : > { %v2050_v0 = vpop.eup %2049 }
 0x3d1   : > { %1551 = vst [vmem:[%s2268_s8 + $0x40] sm:$0xff] %v1535_v23  ;;  %v1538_v30 = vsub.f32 %v2497_v34, %v1518_v63  ;;  %v1520_v1 = vmul.f32 0.6931472, %v2050_v0 }
 0x3d2   : > { %v2052_v2 = vpop.eup %2051 }
 0x3d3   : > { %1554 = vst [vmem:[%s2268_s8 + $0x58] sm:$0xff] %v1538_v30  ;;  %v1539_v27 = vsub.f32 %v2506_v44, %v1520_v1  ;;  %v1514_v3 = vmul.f32 0.6931472, %v2052_v2 }
 0x3d4   : > { %v2054_v4 = vpop.eup %2053 }
 0x3d5   : > { %1555 = vst [vmem:[%s2268_s8 + $0x60] sm:$0xff] %v1539_v27  ;;  %v1536_v6 = vsub.f32 %v2504_v41, %v1514_v3  ;;  %v1524_v7 = vmul.f32 0.6931472, %v2054_v4 }
 0x3d6   : > { %v2056_v37 = vpop.eup %2055 }
 0x3d7   : > { %1552 = vst [vmem:[%s2268_s8 + $0x48] sm:$0xff] %v1536_v6  ;;  %v1541_v8 = vsub.f32 %v2511_v51, %v1524_v7  ;;  %v1522_v10 = vmul.f32 0.6931472, %v2056_v37 }
 0x3d9   : > { %1557 = vst [vmem:[%s2268_s8 + $0x70] sm:$0xff] %v1541_v8  ;;  %v1540_v34 = vsub.f32 %v2514_v52, %v1522_v10 }
 0x3da   : > { %v2058_v11 = vpop.eup %2057 }
 0x3db   : > { %1556 = vst [vmem:[%s2268_s8 + $0x68] sm:$0xff] %v1540_v34  ;;  %v1526_v13 = vmul.f32 0.6931472, %v2058_v11 }
 0x3dd   : > { %v1542_v44 = vsub.f32 %v2519_v59, %v1526_v13 }
 0x3df   : > { %1558 = vst [vmem:[%s2268_s8 + $0x78] sm:$0xff] %v1542_v44 }
 0x3e0 PF: > { %s19_s15 = sadd.s32 1, %s2113_s15   ;;  %s2589_s18 = sld [smem:[#allocation4_spill]] }
 0x3e1   : > { %p16_p0 = scmp.ge.s32.totalorder %s19_s15, 6   ;;  %s2590_s30 = smov %s2093_s10 }
 0x3e2   : > { %s2591_s10 = smov %s2218_s20  ;;  %s2592_s11 = smov %s2105_s13 }
 0x3e3   : > { %s2593_s12 = smov %s2109_s14  ;;  %s2594_s13 = smov %s2597_s7 }
 0x3e4   :  { %18 = sbr.rel (!%p16_p0) target bundleno = 6 (0x6), region = 149 }
 0x3e6   : > { %s2595_s14 = smov %s2589_s18 }

</bundles_post_ra>
